<compile_context>
chip_gen: v7x
topology: tpu7x:2x2x1
jax: 0.10.0
libtpu: 0.0.40
codegen_flags: <defaults>
</compile_context>

<pallas_src>
import jax
import jax.numpy as jnp
import numpy as np
from jax.experimental import pallas as pl
from jax.experimental.pallas import tpu as pltpu


# ----------------------------------------------------------------------------
# The single fused kernel (processes one image per grid step)
# ----------------------------------------------------------------------------
def _net_kernel(x_ref, d1_ref, w1b_ref, b1r_ref, cw1e_ref, cw1o_ref,
                rh1e_ref, rh1o_ref, d2_ref, w2b_ref, b2r_ref, cw2e_ref,
                cw2o_ref, rh2e_ref, rh2o_ref, wf1_ref, bf1r_ref, wf2_ref,
                bf2r_ref, o_ref):
    f32 = jnp.float32
    img = x_ref[0, 0]                                               # [28, 28]

    # --- conv1: 5 banded matmuls (one per kernel row) -> a1[i, j*10+c] -------
    a1 = jnp.zeros((24, 240), f32)
    for dy in range(5):
        band = jnp.dot(d1_ref[dy], img, preferred_element_type=f32)          # rows dy..dy+23
        a1 = a1 + jnp.dot(band, w1b_ref[dy], preferred_element_type=f32)     # [24, 240]
    a1 = a1 + b1r_ref[...]

    # --- 2x2 max-pool + relu via exact selection matmuls -> p1[i, j*10+c] ----
    mw1 = jnp.maximum(jnp.dot(a1, cw1e_ref[...], preferred_element_type=f32),
                      jnp.dot(a1, cw1o_ref[...], preferred_element_type=f32))  # [24, 120]
    p1 = jnp.maximum(jnp.dot(rh1e_ref[...], mw1, preferred_element_type=f32),
                     jnp.dot(rh1o_ref[...], mw1, preferred_element_type=f32))  # [12, 120]
    p1 = jnp.maximum(p1, 0.0)

    # --- conv2 (Dropout2d == identity in eval mode) -> a2[i, j*20+k] ---------
    a2 = jnp.zeros((8, 160), f32)
    for dy in range(5):
        band = jnp.dot(d2_ref[dy], p1, preferred_element_type=f32)           # [8, 120]
        a2 = a2 + jnp.dot(band, w2b_ref[dy], preferred_element_type=f32)     # [8, 160]
    a2 = a2 + b2r_ref[...]

    # --- 2x2 max-pool + relu fused with flatten + fc1 ------------------------
    mw2 = jnp.maximum(jnp.dot(a2, cw2e_ref[...], preferred_element_type=f32),
                      jnp.dot(a2, cw2o_ref[...], preferred_element_type=f32))  # [8, 80]
    h = bf1r_ref[...]                                                          # [1, 50]
    for i in range(4):
        row = jnp.maximum(
            jnp.dot(rh2e_ref[i], mw2, preferred_element_type=f32),
            jnp.dot(rh2o_ref[i], mw2, preferred_element_type=f32))             # [1, 80]
        row = jnp.maximum(row, 0.0)                                            # relu after pool
        h = h + jnp.dot(row, wf1_ref[i], preferred_element_type=f32)           # [1, 50]
    h = jnp.maximum(h, 0.0)
    # F.dropout: identity in eval mode

    # --- fc2 + log_softmax ----------------------------------------------------
    logits = jnp.dot(h, wf2_ref[...], preferred_element_type=f32) + bf2r_ref[...]  # [1, 10]
    m = jnp.max(logits, axis=-1, keepdims=True)
    z = logits - m
    lse = jnp.log(jnp.sum(jnp.exp(z), axis=-1, keepdims=True))
    o_ref[0] = z - lse


# ----------------------------------------------------------------------------
# Forward pass: one pallas_call, grid over batch ("parallel" for v7x 2 TCs)
# ----------------------------------------------------------------------------
@jax.jit
def net_forward(x_nchw, prep):
    B = x_nchw.shape[0]
    out = pl.pallas_call(
        _net_kernel,
        out_shape=jax.ShapeDtypeStruct((B, 1, 10), jnp.float32),
        grid=(B,),
        in_specs=[
            pl.BlockSpec((1, 1, 28, 28), lambda b: (b, 0, 0, 0)),   # image
            pl.BlockSpec((5, 24, 28), lambda b: (0, 0, 0)),          # d1
            pl.BlockSpec((5, 28, 240), lambda b: (0, 0, 0)),         # w1b
            pl.BlockSpec((1, 240), lambda b: (0, 0)),                # b1r
            pl.BlockSpec((240, 120), lambda b: (0, 0)),              # cw1e
            pl.BlockSpec((240, 120), lambda b: (0, 0)),              # cw1o
            pl.BlockSpec((12, 24), lambda b: (0, 0)),                # rh1e
            pl.BlockSpec((12, 24), lambda b: (0, 0)),                # rh1o
            pl.BlockSpec((5, 8, 12), lambda b: (0, 0, 0)),           # d2
            pl.BlockSpec((5, 120, 160), lambda b: (0, 0, 0)),        # w2b
            pl.BlockSpec((1, 160), lambda b: (0, 0)),                # b2r
            pl.BlockSpec((160, 80), lambda b: (0, 0)),               # cw2e
            pl.BlockSpec((160, 80), lambda b: (0, 0)),               # cw2o
            pl.BlockSpec((4, 1, 8), lambda b: (0, 0, 0)),            # rh2e
            pl.BlockSpec((4, 1, 8), lambda b: (0, 0, 0)),            # rh2o
            pl.BlockSpec((4, 80, 50), lambda b: (0, 0, 0)),          # wf1_3d
            pl.BlockSpec((1, 50), lambda b: (0, 0)),                 # bf1r
            pl.BlockSpec((50, 10), lambda b: (0, 0)),                # wf2
            pl.BlockSpec((1, 10), lambda b: (0, 0)),                 # bf2r
        ],
        out_specs=pl.BlockSpec((1, 1, 10), lambda b: (b, 0, 0)),
        compiler_params=pltpu.CompilerParams(
            dimension_semantics=("parallel",)),
    )(x_nchw, prep["d1"], prep["w1b"], prep["b1r"], prep["cw1e"], prep["cw1o"],
      prep["rh1e"], prep["rh1o"], prep["d2"], prep["w2b"], prep["b2r"],
      prep["cw2e"], prep["cw2o"], prep["rh2e"], prep["rh2o"],
      prep["wf1_3d"], prep["bf1r"], prep["wf2"], prep["bf2r"])
    return out.reshape(B, 10)


# ----------------------------------------------------------------------------
# One-time (host-side) parameter preprocessing: banded conv weights, pooling
# selection matrices, row-shift selectors, fc1 row permutation, bias rows.
# ----------------------------------------------------------------------------
def prepare_params(p):
    w1 = np.asarray(p["w1"], np.float32)    # [5,5,1,10]  (kh,kw,cin,cout)
    b1 = np.asarray(p["b1"], np.float32)
    w2 = np.asarray(p["w2"], np.float32)    # [5,5,10,20]
    b2 = np.asarray(p["b2"], np.float32)
    wf1 = np.asarray(p["wf1"], np.float32)  # [320,50]
    bf1 = np.asarray(p["bf1"], np.float32)
    wf2 = np.asarray(p["wf2"], np.float32)  # [50,10]
    bf2 = np.asarray(p["bf2"], np.float32)

    # conv1: banded weights; out column layout is j*10 + c.
    w1b = np.zeros((5, 28, 240), np.float32)
    for dy in range(5):
        for j in range(24):
            for dx in range(5):
                w1b[dy, j + dx, j * 10:(j + 1) * 10] = w1[dy, dx, 0, :]
    d1 = np.zeros((5, 24, 28), np.float32)
    for dy in range(5):
        d1[dy, np.arange(24), np.arange(24) + dy] = 1.0
    b1r = np.tile(b1, 24)[None, :]                                   # [1, 240]

    # pool1 even/odd column & row selectors.
    cw1e = np.zeros((240, 120), np.float32)
    cw1o = np.zeros((240, 120), np.float32)
    for j in range(12):
        for c in range(10):
            cw1e[(2 * j) * 10 + c, j * 10 + c] = 1.0
            cw1o[(2 * j + 1) * 10 + c, j * 10 + c] = 1.0
    rh1e = np.zeros((12, 24), np.float32)
    rh1o = np.zeros((12, 24), np.float32)
    rh1e[np.arange(12), 2 * np.arange(12)] = 1.0
    rh1o[np.arange(12), 2 * np.arange(12) + 1] = 1.0

    # conv2: banded weights; in columns x*10 + c, out columns j*20 + k.
    w2b = np.zeros((5, 120, 160), np.float32)
    for dy in range(5):
        for j in range(8):
            for dx in range(5):
                x = j + dx
                w2b[dy, x * 10:(x + 1) * 10, j * 20:(j + 1) * 20] = w2[dy, dx, :, :]
    d2 = np.zeros((5, 8, 12), np.float32)
    for dy in range(5):
        d2[dy, np.arange(8), np.arange(8) + dy] = 1.0
    b2r = np.tile(b2, 8)[None, :]                                    # [1, 160]

    # pool2 even/odd column selectors + per-output-row (4) row selectors.
    cw2e = np.zeros((160, 80), np.float32)
    cw2o = np.zeros((160, 80), np.float32)
    for j in range(4):
        for k in range(20):
            cw2e[(2 * j) * 20 + k, j * 20 + k] = 1.0
            cw2o[(2 * j + 1) * 20 + k, j * 20 + k] = 1.0
    rh2e = np.zeros((4, 1, 8), np.float32)
    rh2o = np.zeros((4, 1, 8), np.float32)
    for i in range(4):
        rh2e[i, 0, 2 * i] = 1.0
        rh2o[i, 0, 2 * i + 1] = 1.0

    # fc1: permute rows from PyTorch CHW-flatten order (c*16 + h*4 + w) to the
    # kernel's (row i=h, lane j*20 + k) layout -> [4, 80, 50].
    wf1_3d = np.zeros((4, 80, 50), np.float32)
    for i in range(4):
        for j in range(4):
            for k in range(20):
                wf1_3d[i, j * 20 + k, :] = wf1[k * 16 + i * 4 + j, :]

    prep = dict(d1=d1, w1b=w1b, b1r=b1r, cw1e=cw1e, cw1o=cw1o, rh1e=rh1e,
                rh1o=rh1o, d2=d2, w2b=w2b, b2r=b2r, cw2e=cw2e, cw2o=cw2o,
                rh2e=rh2e, rh2o=rh2o, wf1_3d=wf1_3d, bf1r=bf1[None, :],
                wf2=wf2, bf2r=bf2[None, :])
    return jax.tree_util.tree_map(jnp.asarray, prep)


# ----------------------------------------------------------------------------
# Pure-JAX reference (lax conv / reduce_window / log_softmax) for validation
# ----------------------------------------------------------------------------
def ref_forward(x_nchw, p):
    w1 = jnp.transpose(p["w1"], (3, 2, 0, 1))  # OIHW
    y = jax.lax.conv_general_dilated(x_nchw, w1, (1, 1), "VALID")
    y = y + p["b1"][None, :, None, None]
    y = jax.lax.reduce_window(y, -jnp.inf, jax.lax.max, (1, 1, 2, 2), (1, 1, 2, 2), "VALID")
    y = jnp.maximum(y, 0.0)
    w2 = jnp.transpose(p["w2"], (3, 2, 0, 1))
    y = jax.lax.conv_general_dilated(y, w2, (1, 1), "VALID")
    y = y + p["b2"][None, :, None, None]
    y = jax.lax.reduce_window(y, -jnp.inf, jax.lax.max, (1, 1, 2, 2), (1, 1, 2, 2), "VALID")
    y = jnp.maximum(y, 0.0)
    y = y.reshape(y.shape[0], -1)
    y = jnp.maximum(y @ p["wf1"] + p["bf1"], 0.0)
    y = y @ p["wf2"] + p["bf2"]
    return jax.nn.log_softmax(y, axis=1)


# ----------------------------------------------------------------------------
# Deterministic parameter construction + run
# ----------------------------------------------------------------------------
def make_params(key):
    ks = jax.random.split(key, 8)
    return {
        "w1": 0.1 * jax.random.normal(ks[0], (5, 5, 1, 10), jnp.float32),
        "b1": 0.1 * jax.random.normal(ks[1], (10,), jnp.float32),
        "w2": 0.1 * jax.random.normal(ks[2], (5, 5, 10, 20), jnp.float32),
        "b2": 0.1 * jax.random.normal(ks[3], (20,), jnp.float32),
        "wf1": 0.05 * jax.random.normal(ks[4], (320, 50), jnp.float32),
        "bf1": 0.05 * jax.random.normal(ks[5], (50,), jnp.float32),
        "wf2": 0.05 * jax.random.normal(ks[6], (50, 10), jnp.float32),
        "bf2": 0.05 * jax.random.normal(ks[7], (10,), jnp.float32),
    }


if __name__ == "__main__":
    key = jax.random.PRNGKey(0)
    kx, kp = jax.random.split(key)
    # fc1 expects 320 = 20*4*4 features -> input must be [B, 1, 28, 28] (MNIST).
    x = jax.random.normal(kx, (2, 1, 28, 28), jnp.float32)
    params = make_params(kp)
    prep = prepare_params(params)           # one-time, off the hot path

    out = jax.block_until_ready(net_forward(x, prep))
    assert out.shape == (2, 10)

    ref = jax.block_until_ready(ref_forward(x, params))
    np.testing.assert_allclose(np.asarray(out), np.asarray(ref), rtol=1e-4, atol=2e-4)

    print("KERNEL_OK")
</pallas_src>

<mosaic_0001>
module attributes {stable_mosaic.version = 11 : i64} {
  func.func @_net_kernel(%arg0: i32, %arg1: memref<1x1x28x28xf32, #tpu.memory_space<vmem>>, %arg2: memref<5x24x28xf32, #tpu.memory_space<vmem>>, %arg3: memref<5x28x240xf32, #tpu.memory_space<vmem>>, %arg4: memref<1x240xf32, #tpu.memory_space<vmem>>, %arg5: memref<240x120xf32, #tpu.memory_space<vmem>>, %arg6: memref<240x120xf32, #tpu.memory_space<vmem>>, %arg7: memref<12x24xf32, #tpu.memory_space<vmem>>, %arg8: memref<12x24xf32, #tpu.memory_space<vmem>>, %arg9: memref<5x8x12xf32, #tpu.memory_space<vmem>>, %arg10: memref<5x120x160xf32, #tpu.memory_space<vmem>>, %arg11: memref<1x160xf32, #tpu.memory_space<vmem>>, %arg12: memref<160x80xf32, #tpu.memory_space<vmem>>, %arg13: memref<160x80xf32, #tpu.memory_space<vmem>>, %arg14: memref<4x1x8xf32, #tpu.memory_space<vmem>>, %arg15: memref<4x1x8xf32, #tpu.memory_space<vmem>>, %arg16: memref<4x80x50xf32, #tpu.memory_space<vmem>>, %arg17: memref<1x50xf32, #tpu.memory_space<vmem>>, %arg18: memref<50x10xf32, #tpu.memory_space<vmem>>, %arg19: memref<1x10xf32, #tpu.memory_space<vmem>>, %arg20: memref<1x1x10xf32, #tpu.memory_space<vmem>>) attributes {dimension_semantics = [#tpu.dimension_semantics<parallel>], iteration_bounds = array<i64: 2>, scalar_prefetch = 0 : i64, scratch_operands = 0 : i64, tpu.core_type = #tpu.core_type<tc>, window_params = [{transform_indices = @transform_0, window_bounds = array<i64: 1, 1, 28, 28>}, {pipeline_mode = #tpu.pipeline_mode<synchronous>, transform_indices = @transform_1, window_bounds = array<i64: 5, 24, 28>}, {pipeline_mode = #tpu.pipeline_mode<synchronous>, transform_indices = @transform_2, window_bounds = array<i64: 5, 28, 240>}, {pipeline_mode = #tpu.pipeline_mode<synchronous>, transform_indices = @transform_3, window_bounds = array<i64: 1, 240>}, {pipeline_mode = #tpu.pipeline_mode<synchronous>, transform_indices = @transform_4, window_bounds = array<i64: 240, 120>}, {pipeline_mode = #tpu.pipeline_mode<synchronous>, transform_indices = @transform_5, window_bounds = array<i64: 240, 120>}, {pipeline_mode = #tpu.pipeline_mode<synchronous>, transform_indices = @transform_6, window_bounds = array<i64: 12, 24>}, {pipeline_mode = #tpu.pipeline_mode<synchronous>, transform_indices = @transform_7, window_bounds = array<i64: 12, 24>}, {pipeline_mode = #tpu.pipeline_mode<synchronous>, transform_indices = @transform_8, window_bounds = array<i64: 5, 8, 12>}, {pipeline_mode = #tpu.pipeline_mode<synchronous>, transform_indices = @transform_9, window_bounds = array<i64: 5, 120, 160>}, {pipeline_mode = #tpu.pipeline_mode<synchronous>, transform_indices = @transform_10, window_bounds = array<i64: 1, 160>}, {pipeline_mode = #tpu.pipeline_mode<synchronous>, transform_indices = @transform_11, window_bounds = array<i64: 160, 80>}, {pipeline_mode = #tpu.pipeline_mode<synchronous>, transform_indices = @transform_12, window_bounds = array<i64: 160, 80>}, {pipeline_mode = #tpu.pipeline_mode<synchronous>, transform_indices = @transform_13, window_bounds = array<i64: 4, 1, 8>}, {pipeline_mode = #tpu.pipeline_mode<synchronous>, transform_indices = @transform_14, window_bounds = array<i64: 4, 1, 8>}, {pipeline_mode = #tpu.pipeline_mode<synchronous>, transform_indices = @transform_15, window_bounds = array<i64: 4, 80, 50>}, {pipeline_mode = #tpu.pipeline_mode<synchronous>, transform_indices = @transform_16, window_bounds = array<i64: 1, 50>}, {pipeline_mode = #tpu.pipeline_mode<synchronous>, transform_indices = @transform_17, window_bounds = array<i64: 50, 10>}, {pipeline_mode = #tpu.pipeline_mode<synchronous>, transform_indices = @transform_18, window_bounds = array<i64: 1, 10>}, {transform_indices = @transform_19, window_bounds = array<i64: 1, 1, 10>}]} {
    %c0 = arith.constant 0 : index
    %c0_0 = arith.constant 0 : index
    %c0_1 = arith.constant 0 : index
    %c0_2 = arith.constant 0 : index
    %0 = vector.load %arg1[%c0, %c0_0, %c0_1, %c0_2] : memref<1x1x28x28xf32, #tpu.memory_space<vmem>>, vector<1x1x28x28xf32>
    %1 = vector.shape_cast %0 : vector<1x1x28x28xf32> to vector<28x28xf32>
    %cst = arith.constant 0.000000e+00 : f32
    %2 = vector.broadcast %cst : f32 to vector<24x240xf32>
    %c0_3 = arith.constant 0 : index
    %c0_4 = arith.constant 0 : index
    %c0_5 = arith.constant 0 : index
    %3 = vector.load %arg2[%c0_3, %c0_4, %c0_5] : memref<5x24x28xf32, #tpu.memory_space<vmem>>, vector<1x24x28xf32>
    %4 = vector.shape_cast %3 : vector<1x24x28xf32> to vector<24x28xf32>
    %cst_6 = arith.constant dense<0.000000e+00> : vector<24x28xf32>
    %5 = tpu.matmul %4, %1, %cst_6 {dimension_numbers = #tpu.dot_dimension_numbers<[1], [0], [0], [1], [0, 0, 1, 1], [], []>} : vector<24x28xf32>, vector<28x28xf32>, vector<24x28xf32> -> vector<24x28xf32>
    %c0_7 = arith.constant 0 : index
    %c0_8 = arith.constant 0 : index
    %c0_9 = arith.constant 0 : index
    %6 = vector.load %arg3[%c0_7, %c0_8, %c0_9] : memref<5x28x240xf32, #tpu.memory_space<vmem>>, vector<1x28x240xf32>
    %7 = vector.shape_cast %6 : vector<1x28x240xf32> to vector<28x240xf32>
    %cst_10 = arith.constant dense<0.000000e+00> : vector<24x240xf32>
    %8 = tpu.matmul %5, %7, %cst_10 {dimension_numbers = #tpu.dot_dimension_numbers<[1], [0], [0], [1], [0, 0, 1, 1], [], []>} : vector<24x28xf32>, vector<28x240xf32>, vector<24x240xf32> -> vector<24x240xf32>
    %9 = arith.addf %2, %8 : vector<24x240xf32>
    %c1 = arith.constant 1 : index
    %c0_11 = arith.constant 0 : index
    %c0_12 = arith.constant 0 : index
    %10 = vector.load %arg2[%c1, %c0_11, %c0_12] : memref<5x24x28xf32, #tpu.memory_space<vmem>>, vector<1x24x28xf32>
    %11 = vector.shape_cast %10 : vector<1x24x28xf32> to vector<24x28xf32>
    %cst_13 = arith.constant dense<0.000000e+00> : vector<24x28xf32>
    %12 = tpu.matmul %11, %1, %cst_13 {dimension_numbers = #tpu.dot_dimension_numbers<[1], [0], [0], [1], [0, 0, 1, 1], [], []>} : vector<24x28xf32>, vector<28x28xf32>, vector<24x28xf32> -> vector<24x28xf32>
    %c1_14 = arith.constant 1 : index
    %c0_15 = arith.constant 0 : index
    %c0_16 = arith.constant 0 : index
    %13 = vector.load %arg3[%c1_14, %c0_15, %c0_16] : memref<5x28x240xf32, #tpu.memory_space<vmem>>, vector<1x28x240xf32>
    %14 = vector.shape_cast %13 : vector<1x28x240xf32> to vector<28x240xf32>
    %cst_17 = arith.constant dense<0.000000e+00> : vector<24x240xf32>
    %15 = tpu.matmul %12, %14, %cst_17 {dimension_numbers = #tpu.dot_dimension_numbers<[1], [0], [0], [1], [0, 0, 1, 1], [], []>} : vector<24x28xf32>, vector<28x240xf32>, vector<24x240xf32> -> vector<24x240xf32>
    %16 = arith.addf %9, %15 : vector<24x240xf32>
    %c2 = arith.constant 2 : index
    %c0_18 = arith.constant 0 : index
    %c0_19 = arith.constant 0 : index
    %17 = vector.load %arg2[%c2, %c0_18, %c0_19] : memref<5x24x28xf32, #tpu.memory_space<vmem>>, vector<1x24x28xf32>
    %18 = vector.shape_cast %17 : vector<1x24x28xf32> to vector<24x28xf32>
    %cst_20 = arith.constant dense<0.000000e+00> : vector<24x28xf32>
    %19 = tpu.matmul %18, %1, %cst_20 {dimension_numbers = #tpu.dot_dimension_numbers<[1], [0], [0], [1], [0, 0, 1, 1], [], []>} : vector<24x28xf32>, vector<28x28xf32>, vector<24x28xf32> -> vector<24x28xf32>
    %c2_21 = arith.constant 2 : index
    %c0_22 = arith.constant 0 : index
    %c0_23 = arith.constant 0 : index
    %20 = vector.load %arg3[%c2_21, %c0_22, %c0_23] : memref<5x28x240xf32, #tpu.memory_space<vmem>>, vector<1x28x240xf32>
    %21 = vector.shape_cast %20 : vector<1x28x240xf32> to vector<28x240xf32>
    %cst_24 = arith.constant dense<0.000000e+00> : vector<24x240xf32>
    %22 = tpu.matmul %19, %21, %cst_24 {dimension_numbers = #tpu.dot_dimension_numbers<[1], [0], [0], [1], [0, 0, 1, 1], [], []>} : vector<24x28xf32>, vector<28x240xf32>, vector<24x240xf32> -> vector<24x240xf32>
    %23 = arith.addf %16, %22 : vector<24x240xf32>
    %c3 = arith.constant 3 : index
    %c0_25 = arith.constant 0 : index
    %c0_26 = arith.constant 0 : index
    %24 = vector.load %arg2[%c3, %c0_25, %c0_26] : memref<5x24x28xf32, #tpu.memory_space<vmem>>, vector<1x24x28xf32>
    %25 = vector.shape_cast %24 : vector<1x24x28xf32> to vector<24x28xf32>
    %cst_27 = arith.constant dense<0.000000e+00> : vector<24x28xf32>
    %26 = tpu.matmul %25, %1, %cst_27 {dimension_numbers = #tpu.dot_dimension_numbers<[1], [0], [0], [1], [0, 0, 1, 1], [], []>} : vector<24x28xf32>, vector<28x28xf32>, vector<24x28xf32> -> vector<24x28xf32>
    %c3_28 = arith.constant 3 : index
    %c0_29 = arith.constant 0 : index
    %c0_30 = arith.constant 0 : index
    %27 = vector.load %arg3[%c3_28, %c0_29, %c0_30] : memref<5x28x240xf32, #tpu.memory_space<vmem>>, vector<1x28x240xf32>
    %28 = vector.shape_cast %27 : vector<1x28x240xf32> to vector<28x240xf32>
    %cst_31 = arith.constant dense<0.000000e+00> : vector<24x240xf32>
    %29 = tpu.matmul %26, %28, %cst_31 {dimension_numbers = #tpu.dot_dimension_numbers<[1], [0], [0], [1], [0, 0, 1, 1], [], []>} : vector<24x28xf32>, vector<28x240xf32>, vector<24x240xf32> -> vector<24x240xf32>
    %30 = arith.addf %23, %29 : vector<24x240xf32>
    %c4 = arith.constant 4 : index
    %c0_32 = arith.constant 0 : index
    %c0_33 = arith.constant 0 : index
    %31 = vector.load %arg2[%c4, %c0_32, %c0_33] : memref<5x24x28xf32, #tpu.memory_space<vmem>>, vector<1x24x28xf32>
    %32 = vector.shape_cast %31 : vector<1x24x28xf32> to vector<24x28xf32>
    %cst_34 = arith.constant dense<0.000000e+00> : vector<24x28xf32>
    %33 = tpu.matmul %32, %1, %cst_34 {dimension_numbers = #tpu.dot_dimension_numbers<[1], [0], [0], [1], [0, 0, 1, 1], [], []>} : vector<24x28xf32>, vector<28x28xf32>, vector<24x28xf32> -> vector<24x28xf32>
    %c4_35 = arith.constant 4 : index
    %c0_36 = arith.constant 0 : index
    %c0_37 = arith.constant 0 : index
    %34 = vector.load %arg3[%c4_35, %c0_36, %c0_37] : memref<5x28x240xf32, #tpu.memory_space<vmem>>, vector<1x28x240xf32>
    %35 = vector.shape_cast %34 : vector<1x28x240xf32> to vector<28x240xf32>
    %cst_38 = arith.constant dense<0.000000e+00> : vector<24x240xf32>
    %36 = tpu.matmul %33, %35, %cst_38 {dimension_numbers = #tpu.dot_dimension_numbers<[1], [0], [0], [1], [0, 0, 1, 1], [], []>} : vector<24x28xf32>, vector<28x240xf32>, vector<24x240xf32> -> vector<24x240xf32>
    %37 = arith.addf %30, %36 : vector<24x240xf32>
    %c0_39 = arith.constant 0 : index
    %c0_40 = arith.constant 0 : index
    %38 = vector.load %arg4[%c0_39, %c0_40] : memref<1x240xf32, #tpu.memory_space<vmem>>, vector<1x240xf32>
    %39 = vector.broadcast %38 : vector<1x240xf32> to vector<24x240xf32>
    %40 = arith.addf %37, %39 : vector<24x240xf32>
    %c0_41 = arith.constant 0 : index
    %c0_42 = arith.constant 0 : index
    %41 = vector.load %arg5[%c0_41, %c0_42] : memref<240x120xf32, #tpu.memory_space<vmem>>, vector<240x120xf32>
    %cst_43 = arith.constant dense<0.000000e+00> : vector<24x120xf32>
    %42 = tpu.matmul %40, %41, %cst_43 {dimension_numbers = #tpu.dot_dimension_numbers<[1], [0], [0], [1], [0, 0, 1, 1], [], []>} : vector<24x240xf32>, vector<240x120xf32>, vector<24x120xf32> -> vector<24x120xf32>
    %c0_44 = arith.constant 0 : index
    %c0_45 = arith.constant 0 : index
    %43 = vector.load %arg6[%c0_44, %c0_45] : memref<240x120xf32, #tpu.memory_space<vmem>>, vector<240x120xf32>
    %cst_46 = arith.constant dense<0.000000e+00> : vector<24x120xf32>
    %44 = tpu.matmul %40, %43, %cst_46 {dimension_numbers = #tpu.dot_dimension_numbers<[1], [0], [0], [1], [0, 0, 1, 1], [], []>} : vector<24x240xf32>, vector<240x120xf32>, vector<24x120xf32> -> vector<24x120xf32>
    %45 = arith.maximumf %42, %44 : vector<24x120xf32>
    %c0_47 = arith.constant 0 : index
    %c0_48 = arith.constant 0 : index
    %46 = vector.load %arg7[%c0_47, %c0_48] : memref<12x24xf32, #tpu.memory_space<vmem>>, vector<12x24xf32>
    %cst_49 = arith.constant dense<0.000000e+00> : vector<12x120xf32>
    %47 = tpu.matmul %46, %45, %cst_49 {dimension_numbers = #tpu.dot_dimension_numbers<[1], [0], [0], [1], [0, 0, 1, 1], [], []>} : vector<12x24xf32>, vector<24x120xf32>, vector<12x120xf32> -> vector<12x120xf32>
    %c0_50 = arith.constant 0 : index
    %c0_51 = arith.constant 0 : index
    %48 = vector.load %arg8[%c0_50, %c0_51] : memref<12x24xf32, #tpu.memory_space<vmem>>, vector<12x24xf32>
    %cst_52 = arith.constant dense<0.000000e+00> : vector<12x120xf32>
    %49 = tpu.matmul %48, %45, %cst_52 {dimension_numbers = #tpu.dot_dimension_numbers<[1], [0], [0], [1], [0, 0, 1, 1], [], []>} : vector<12x24xf32>, vector<24x120xf32>, vector<12x120xf32> -> vector<12x120xf32>
    %50 = arith.maximumf %47, %49 : vector<12x120xf32>
    %cst_53 = arith.constant 0.000000e+00 : f32
    %51 = vector.broadcast %cst_53 : f32 to vector<12x120xf32>
    %52 = arith.maximumf %50, %51 : vector<12x120xf32>
    %cst_54 = arith.constant 0.000000e+00 : f32
    %53 = vector.broadcast %cst_54 : f32 to vector<8x160xf32>
    %c0_55 = arith.constant 0 : index
    %c0_56 = arith.constant 0 : index
    %c0_57 = arith.constant 0 : index
    %54 = vector.load %arg9[%c0_55, %c0_56, %c0_57] : memref<5x8x12xf32, #tpu.memory_space<vmem>>, vector<1x8x12xf32>
    %55 = vector.shape_cast %54 : vector<1x8x12xf32> to vector<8x12xf32>
    %cst_58 = arith.constant dense<0.000000e+00> : vector<8x120xf32>
    %56 = tpu.matmul %55, %52, %cst_58 {dimension_numbers = #tpu.dot_dimension_numbers<[1], [0], [0], [1], [0, 0, 1, 1], [], []>} : vector<8x12xf32>, vector<12x120xf32>, vector<8x120xf32> -> vector<8x120xf32>
    %c0_59 = arith.constant 0 : index
    %c0_60 = arith.constant 0 : index
    %c0_61 = arith.constant 0 : index
    %57 = vector.load %arg10[%c0_59, %c0_60, %c0_61] : memref<5x120x160xf32, #tpu.memory_space<vmem>>, vector<1x120x160xf32>
    %58 = vector.shape_cast %57 : vector<1x120x160xf32> to vector<120x160xf32>
    %cst_62 = arith.constant dense<0.000000e+00> : vector<8x160xf32>
    %59 = tpu.matmul %56, %58, %cst_62 {dimension_numbers = #tpu.dot_dimension_numbers<[1], [0], [0], [1], [0, 0, 1, 1], [], []>} : vector<8x120xf32>, vector<120x160xf32>, vector<8x160xf32> -> vector<8x160xf32>
    %60 = arith.addf %53, %59 : vector<8x160xf32>
    %c1_63 = arith.constant 1 : index
    %c0_64 = arith.constant 0 : index
    %c0_65 = arith.constant 0 : index
    %61 = vector.load %arg9[%c1_63, %c0_64, %c0_65] : memref<5x8x12xf32, #tpu.memory_space<vmem>>, vector<1x8x12xf32>
    %62 = vector.shape_cast %61 : vector<1x8x12xf32> to vector<8x12xf32>
    %cst_66 = arith.constant dense<0.000000e+00> : vector<8x120xf32>
    %63 = tpu.matmul %62, %52, %cst_66 {dimension_numbers = #tpu.dot_dimension_numbers<[1], [0], [0], [1], [0, 0, 1, 1], [], []>} : vector<8x12xf32>, vector<12x120xf32>, vector<8x120xf32> -> vector<8x120xf32>
    %c1_67 = arith.constant 1 : index
    %c0_68 = arith.constant 0 : index
    %c0_69 = arith.constant 0 : index
    %64 = vector.load %arg10[%c1_67, %c0_68, %c0_69] : memref<5x120x160xf32, #tpu.memory_space<vmem>>, vector<1x120x160xf32>
    %65 = vector.shape_cast %64 : vector<1x120x160xf32> to vector<120x160xf32>
    %cst_70 = arith.constant dense<0.000000e+00> : vector<8x160xf32>
    %66 = tpu.matmul %63, %65, %cst_70 {dimension_numbers = #tpu.dot_dimension_numbers<[1], [0], [0], [1], [0, 0, 1, 1], [], []>} : vector<8x120xf32>, vector<120x160xf32>, vector<8x160xf32> -> vector<8x160xf32>
    %67 = arith.addf %60, %66 : vector<8x160xf32>
    %c2_71 = arith.constant 2 : index
    %c0_72 = arith.constant 0 : index
    %c0_73 = arith.constant 0 : index
    %68 = vector.load %arg9[%c2_71, %c0_72, %c0_73] : memref<5x8x12xf32, #tpu.memory_space<vmem>>, vector<1x8x12xf32>
    %69 = vector.shape_cast %68 : vector<1x8x12xf32> to vector<8x12xf32>
    %cst_74 = arith.constant dense<0.000000e+00> : vector<8x120xf32>
    %70 = tpu.matmul %69, %52, %cst_74 {dimension_numbers = #tpu.dot_dimension_numbers<[1], [0], [0], [1], [0, 0, 1, 1], [], []>} : vector<8x12xf32>, vector<12x120xf32>, vector<8x120xf32> -> vector<8x120xf32>
    %c2_75 = arith.constant 2 : index
    %c0_76 = arith.constant 0 : index
    %c0_77 = arith.constant 0 : index
    %71 = vector.load %arg10[%c2_75, %c0_76, %c0_77] : memref<5x120x160xf32, #tpu.memory_space<vmem>>, vector<1x120x160xf32>
    %72 = vector.shape_cast %71 : vector<1x120x160xf32> to vector<120x160xf32>
    %cst_78 = arith.constant dense<0.000000e+00> : vector<8x160xf32>
    %73 = tpu.matmul %70, %72, %cst_78 {dimension_numbers = #tpu.dot_dimension_numbers<[1], [0], [0], [1], [0, 0, 1, 1], [], []>} : vector<8x120xf32>, vector<120x160xf32>, vector<8x160xf32> -> vector<8x160xf32>
    %74 = arith.addf %67, %73 : vector<8x160xf32>
    %c3_79 = arith.constant 3 : index
    %c0_80 = arith.constant 0 : index
    %c0_81 = arith.constant 0 : index
    %75 = vector.load %arg9[%c3_79, %c0_80, %c0_81] : memref<5x8x12xf32, #tpu.memory_space<vmem>>, vector<1x8x12xf32>
    %76 = vector.shape_cast %75 : vector<1x8x12xf32> to vector<8x12xf32>
    %cst_82 = arith.constant dense<0.000000e+00> : vector<8x120xf32>
    %77 = tpu.matmul %76, %52, %cst_82 {dimension_numbers = #tpu.dot_dimension_numbers<[1], [0], [0], [1], [0, 0, 1, 1], [], []>} : vector<8x12xf32>, vector<12x120xf32>, vector<8x120xf32> -> vector<8x120xf32>
    %c3_83 = arith.constant 3 : index
    %c0_84 = arith.constant 0 : index
    %c0_85 = arith.constant 0 : index
    %78 = vector.load %arg10[%c3_83, %c0_84, %c0_85] : memref<5x120x160xf32, #tpu.memory_space<vmem>>, vector<1x120x160xf32>
    %79 = vector.shape_cast %78 : vector<1x120x160xf32> to vector<120x160xf32>
    %cst_86 = arith.constant dense<0.000000e+00> : vector<8x160xf32>
    %80 = tpu.matmul %77, %79, %cst_86 {dimension_numbers = #tpu.dot_dimension_numbers<[1], [0], [0], [1], [0, 0, 1, 1], [], []>} : vector<8x120xf32>, vector<120x160xf32>, vector<8x160xf32> -> vector<8x160xf32>
    %81 = arith.addf %74, %80 : vector<8x160xf32>
    %c4_87 = arith.constant 4 : index
    %c0_88 = arith.constant 0 : index
    %c0_89 = arith.constant 0 : index
    %82 = vector.load %arg9[%c4_87, %c0_88, %c0_89] : memref<5x8x12xf32, #tpu.memory_space<vmem>>, vector<1x8x12xf32>
    %83 = vector.shape_cast %82 : vector<1x8x12xf32> to vector<8x12xf32>
    %cst_90 = arith.constant dense<0.000000e+00> : vector<8x120xf32>
    %84 = tpu.matmul %83, %52, %cst_90 {dimension_numbers = #tpu.dot_dimension_numbers<[1], [0], [0], [1], [0, 0, 1, 1], [], []>} : vector<8x12xf32>, vector<12x120xf32>, vector<8x120xf32> -> vector<8x120xf32>
    %c4_91 = arith.constant 4 : index
    %c0_92 = arith.constant 0 : index
    %c0_93 = arith.constant 0 : index
    %85 = vector.load %arg10[%c4_91, %c0_92, %c0_93] : memref<5x120x160xf32, #tpu.memory_space<vmem>>, vector<1x120x160xf32>
    %86 = vector.shape_cast %85 : vector<1x120x160xf32> to vector<120x160xf32>
    %cst_94 = arith.constant dense<0.000000e+00> : vector<8x160xf32>
    %87 = tpu.matmul %84, %86, %cst_94 {dimension_numbers = #tpu.dot_dimension_numbers<[1], [0], [0], [1], [0, 0, 1, 1], [], []>} : vector<8x120xf32>, vector<120x160xf32>, vector<8x160xf32> -> vector<8x160xf32>
    %88 = arith.addf %81, %87 : vector<8x160xf32>
    %c0_95 = arith.constant 0 : index
    %c0_96 = arith.constant 0 : index
    %89 = vector.load %arg11[%c0_95, %c0_96] : memref<1x160xf32, #tpu.memory_space<vmem>>, vector<1x160xf32>
    %90 = vector.broadcast %89 : vector<1x160xf32> to vector<8x160xf32>
    %91 = arith.addf %88, %90 : vector<8x160xf32>
    %c0_97 = arith.constant 0 : index
    %c0_98 = arith.constant 0 : index
    %92 = vector.load %arg12[%c0_97, %c0_98] : memref<160x80xf32, #tpu.memory_space<vmem>>, vector<160x80xf32>
    %cst_99 = arith.constant dense<0.000000e+00> : vector<8x80xf32>
    %93 = tpu.matmul %91, %92, %cst_99 {dimension_numbers = #tpu.dot_dimension_numbers<[1], [0], [0], [1], [0, 0, 1, 1], [], []>} : vector<8x160xf32>, vector<160x80xf32>, vector<8x80xf32> -> vector<8x80xf32>
    %c0_100 = arith.constant 0 : index
    %c0_101 = arith.constant 0 : index
    %94 = vector.load %arg13[%c0_100, %c0_101] : memref<160x80xf32, #tpu.memory_space<vmem>>, vector<160x80xf32>
    %cst_102 = arith.constant dense<0.000000e+00> : vector<8x80xf32>
    %95 = tpu.matmul %91, %94, %cst_102 {dimension_numbers = #tpu.dot_dimension_numbers<[1], [0], [0], [1], [0, 0, 1, 1], [], []>} : vector<8x160xf32>, vector<160x80xf32>, vector<8x80xf32> -> vector<8x80xf32>
    %96 = arith.maximumf %93, %95 : vector<8x80xf32>
    %c0_103 = arith.constant 0 : index
    %c0_104 = arith.constant 0 : index
    %97 = vector.load %arg17[%c0_103, %c0_104] : memref<1x50xf32, #tpu.memory_space<vmem>>, vector<1x50xf32>
    %c0_105 = arith.constant 0 : index
    %c0_106 = arith.constant 0 : index
    %c0_107 = arith.constant 0 : index
    %98 = vector.load %arg14[%c0_105, %c0_106, %c0_107] : memref<4x1x8xf32, #tpu.memory_space<vmem>>, vector<1x1x8xf32>
    %99 = vector.shape_cast %98 : vector<1x1x8xf32> to vector<1x8xf32>
    %cst_108 = arith.constant dense<0.000000e+00> : vector<1x80xf32>
    %100 = tpu.matmul %99, %96, %cst_108 {dimension_numbers = #tpu.dot_dimension_numbers<[1], [0], [0], [1], [0, 0, 1, 1], [], []>} : vector<1x8xf32>, vector<8x80xf32>, vector<1x80xf32> -> vector<1x80xf32>
    %c0_109 = arith.constant 0 : index
    %c0_110 = arith.constant 0 : index
    %c0_111 = arith.constant 0 : index
    %101 = vector.load %arg15[%c0_109, %c0_110, %c0_111] : memref<4x1x8xf32, #tpu.memory_space<vmem>>, vector<1x1x8xf32>
    %102 = vector.shape_cast %101 : vector<1x1x8xf32> to vector<1x8xf32>
    %cst_112 = arith.constant dense<0.000000e+00> : vector<1x80xf32>
    %103 = tpu.matmul %102, %96, %cst_112 {dimension_numbers = #tpu.dot_dimension_numbers<[1], [0], [0], [1], [0, 0, 1, 1], [], []>} : vector<1x8xf32>, vector<8x80xf32>, vector<1x80xf32> -> vector<1x80xf32>
    %104 = arith.maximumf %100, %103 : vector<1x80xf32>
    %cst_113 = arith.constant 0.000000e+00 : f32
    %105 = vector.broadcast %cst_113 : f32 to vector<1x80xf32>
    %106 = arith.maximumf %104, %105 : vector<1x80xf32>
    %c0_114 = arith.constant 0 : index
    %c0_115 = arith.constant 0 : index
    %c0_116 = arith.constant 0 : index
    %107 = vector.load %arg16[%c0_114, %c0_115, %c0_116] : memref<4x80x50xf32, #tpu.memory_space<vmem>>, vector<1x80x50xf32>
    %108 = vector.shape_cast %107 : vector<1x80x50xf32> to vector<80x50xf32>
    %cst_117 = arith.constant dense<0.000000e+00> : vector<1x50xf32>
    %109 = tpu.matmul %106, %108, %cst_117 {dimension_numbers = #tpu.dot_dimension_numbers<[1], [0], [0], [1], [0, 0, 1, 1], [], []>} : vector<1x80xf32>, vector<80x50xf32>, vector<1x50xf32> -> vector<1x50xf32>
    %110 = arith.addf %97, %109 : vector<1x50xf32>
    %c1_118 = arith.constant 1 : index
    %c0_119 = arith.constant 0 : index
    %c0_120 = arith.constant 0 : index
    %111 = vector.load %arg14[%c1_118, %c0_119, %c0_120] : memref<4x1x8xf32, #tpu.memory_space<vmem>>, vector<1x1x8xf32>
    %112 = vector.shape_cast %111 : vector<1x1x8xf32> to vector<1x8xf32>
    %cst_121 = arith.constant dense<0.000000e+00> : vector<1x80xf32>
    %113 = tpu.matmul %112, %96, %cst_121 {dimension_numbers = #tpu.dot_dimension_numbers<[1], [0], [0], [1], [0, 0, 1, 1], [], []>} : vector<1x8xf32>, vector<8x80xf32>, vector<1x80xf32> -> vector<1x80xf32>
    %c1_122 = arith.constant 1 : index
    %c0_123 = arith.constant 0 : index
    %c0_124 = arith.constant 0 : index
    %114 = vector.load %arg15[%c1_122, %c0_123, %c0_124] : memref<4x1x8xf32, #tpu.memory_space<vmem>>, vector<1x1x8xf32>
    %115 = vector.shape_cast %114 : vector<1x1x8xf32> to vector<1x8xf32>
    %cst_125 = arith.constant dense<0.000000e+00> : vector<1x80xf32>
    %116 = tpu.matmul %115, %96, %cst_125 {dimension_numbers = #tpu.dot_dimension_numbers<[1], [0], [0], [1], [0, 0, 1, 1], [], []>} : vector<1x8xf32>, vector<8x80xf32>, vector<1x80xf32> -> vector<1x80xf32>
    %117 = arith.maximumf %113, %116 : vector<1x80xf32>
    %cst_126 = arith.constant 0.000000e+00 : f32
    %118 = vector.broadcast %cst_126 : f32 to vector<1x80xf32>
    %119 = arith.maximumf %117, %118 : vector<1x80xf32>
    %c1_127 = arith.constant 1 : index
    %c0_128 = arith.constant 0 : index
    %c0_129 = arith.constant 0 : index
    %120 = vector.load %arg16[%c1_127, %c0_128, %c0_129] : memref<4x80x50xf32, #tpu.memory_space<vmem>>, vector<1x80x50xf32>
    %121 = vector.shape_cast %120 : vector<1x80x50xf32> to vector<80x50xf32>
    %cst_130 = arith.constant dense<0.000000e+00> : vector<1x50xf32>
    %122 = tpu.matmul %119, %121, %cst_130 {dimension_numbers = #tpu.dot_dimension_numbers<[1], [0], [0], [1], [0, 0, 1, 1], [], []>} : vector<1x80xf32>, vector<80x50xf32>, vector<1x50xf32> -> vector<1x50xf32>
    %123 = arith.addf %110, %122 : vector<1x50xf32>
    %c2_131 = arith.constant 2 : index
    %c0_132 = arith.constant 0 : index
    %c0_133 = arith.constant 0 : index
    %124 = vector.load %arg14[%c2_131, %c0_132, %c0_133] : memref<4x1x8xf32, #tpu.memory_space<vmem>>, vector<1x1x8xf32>
    %125 = vector.shape_cast %124 : vector<1x1x8xf32> to vector<1x8xf32>
    %cst_134 = arith.constant dense<0.000000e+00> : vector<1x80xf32>
    %126 = tpu.matmul %125, %96, %cst_134 {dimension_numbers = #tpu.dot_dimension_numbers<[1], [0], [0], [1], [0, 0, 1, 1], [], []>} : vector<1x8xf32>, vector<8x80xf32>, vector<1x80xf32> -> vector<1x80xf32>
    %c2_135 = arith.constant 2 : index
    %c0_136 = arith.constant 0 : index
    %c0_137 = arith.constant 0 : index
    %127 = vector.load %arg15[%c2_135, %c0_136, %c0_137] : memref<4x1x8xf32, #tpu.memory_space<vmem>>, vector<1x1x8xf32>
    %128 = vector.shape_cast %127 : vector<1x1x8xf32> to vector<1x8xf32>
    %cst_138 = arith.constant dense<0.000000e+00> : vector<1x80xf32>
    %129 = tpu.matmul %128, %96, %cst_138 {dimension_numbers = #tpu.dot_dimension_numbers<[1], [0], [0], [1], [0, 0, 1, 1], [], []>} : vector<1x8xf32>, vector<8x80xf32>, vector<1x80xf32> -> vector<1x80xf32>
    %130 = arith.maximumf %126, %129 : vector<1x80xf32>
    %cst_139 = arith.constant 0.000000e+00 : f32
    %131 = vector.broadcast %cst_139 : f32 to vector<1x80xf32>
    %132 = arith.maximumf %130, %131 : vector<1x80xf32>
    %c2_140 = arith.constant 2 : index
    %c0_141 = arith.constant 0 : index
    %c0_142 = arith.constant 0 : index
    %133 = vector.load %arg16[%c2_140, %c0_141, %c0_142] : memref<4x80x50xf32, #tpu.memory_space<vmem>>, vector<1x80x50xf32>
    %134 = vector.shape_cast %133 : vector<1x80x50xf32> to vector<80x50xf32>
    %cst_143 = arith.constant dense<0.000000e+00> : vector<1x50xf32>
    %135 = tpu.matmul %132, %134, %cst_143 {dimension_numbers = #tpu.dot_dimension_numbers<[1], [0], [0], [1], [0, 0, 1, 1], [], []>} : vector<1x80xf32>, vector<80x50xf32>, vector<1x50xf32> -> vector<1x50xf32>
    %136 = arith.addf %123, %135 : vector<1x50xf32>
    %c3_144 = arith.constant 3 : index
    %c0_145 = arith.constant 0 : index
    %c0_146 = arith.constant 0 : index
    %137 = vector.load %arg14[%c3_144, %c0_145, %c0_146] : memref<4x1x8xf32, #tpu.memory_space<vmem>>, vector<1x1x8xf32>
    %138 = vector.shape_cast %137 : vector<1x1x8xf32> to vector<1x8xf32>
    %cst_147 = arith.constant dense<0.000000e+00> : vector<1x80xf32>
    %139 = tpu.matmul %138, %96, %cst_147 {dimension_numbers = #tpu.dot_dimension_numbers<[1], [0], [0], [1], [0, 0, 1, 1], [], []>} : vector<1x8xf32>, vector<8x80xf32>, vector<1x80xf32> -> vector<1x80xf32>
    %c3_148 = arith.constant 3 : index
    %c0_149 = arith.constant 0 : index
    %c0_150 = arith.constant 0 : index
    %140 = vector.load %arg15[%c3_148, %c0_149, %c0_150] : memref<4x1x8xf32, #tpu.memory_space<vmem>>, vector<1x1x8xf32>
    %141 = vector.shape_cast %140 : vector<1x1x8xf32> to vector<1x8xf32>
    %cst_151 = arith.constant dense<0.000000e+00> : vector<1x80xf32>
    %142 = tpu.matmul %141, %96, %cst_151 {dimension_numbers = #tpu.dot_dimension_numbers<[1], [0], [0], [1], [0, 0, 1, 1], [], []>} : vector<1x8xf32>, vector<8x80xf32>, vector<1x80xf32> -> vector<1x80xf32>
    %143 = arith.maximumf %139, %142 : vector<1x80xf32>
    %cst_152 = arith.constant 0.000000e+00 : f32
    %144 = vector.broadcast %cst_152 : f32 to vector<1x80xf32>
    %145 = arith.maximumf %143, %144 : vector<1x80xf32>
    %c3_153 = arith.constant 3 : index
    %c0_154 = arith.constant 0 : index
    %c0_155 = arith.constant 0 : index
    %146 = vector.load %arg16[%c3_153, %c0_154, %c0_155] : memref<4x80x50xf32, #tpu.memory_space<vmem>>, vector<1x80x50xf32>
    %147 = vector.shape_cast %146 : vector<1x80x50xf32> to vector<80x50xf32>
    %cst_156 = arith.constant dense<0.000000e+00> : vector<1x50xf32>
    %148 = tpu.matmul %145, %147, %cst_156 {dimension_numbers = #tpu.dot_dimension_numbers<[1], [0], [0], [1], [0, 0, 1, 1], [], []>} : vector<1x80xf32>, vector<80x50xf32>, vector<1x50xf32> -> vector<1x50xf32>
    %149 = arith.addf %136, %148 : vector<1x50xf32>
    %cst_157 = arith.constant 0.000000e+00 : f32
    %150 = vector.broadcast %cst_157 : f32 to vector<1x50xf32>
    %151 = arith.maximumf %149, %150 : vector<1x50xf32>
    %c0_158 = arith.constant 0 : index
    %c0_159 = arith.constant 0 : index
    %152 = vector.load %arg18[%c0_158, %c0_159] : memref<50x10xf32, #tpu.memory_space<vmem>>, vector<50x10xf32>
    %cst_160 = arith.constant dense<0.000000e+00> : vector<1x10xf32>
    %153 = tpu.matmul %151, %152, %cst_160 {dimension_numbers = #tpu.dot_dimension_numbers<[1], [0], [0], [1], [0, 0, 1, 1], [], []>} : vector<1x50xf32>, vector<50x10xf32>, vector<1x10xf32> -> vector<1x10xf32>
    %c0_161 = arith.constant 0 : index
    %c0_162 = arith.constant 0 : index
    %154 = vector.load %arg19[%c0_161, %c0_162] : memref<1x10xf32, #tpu.memory_space<vmem>>, vector<1x10xf32>
    %155 = arith.addf %153, %154 : vector<1x10xf32>
    %cst_163 = arith.constant dense<0xFF800000> : vector<1xf32>
    %156 = vector.multi_reduction <maximumf>, %155, %cst_163 [1] : vector<1x10xf32> to vector<1xf32>
    %157 = vector.shape_cast %156 : vector<1xf32> to vector<1x1xf32>
    %158 = vector.broadcast %157 : vector<1x1xf32> to vector<1x10xf32>
    %159 = arith.subf %155, %158 : vector<1x10xf32>
    %160 = math.exp %159 : vector<1x10xf32>
    %cst_164 = arith.constant dense<0.000000e+00> : vector<1xf32>
    %161 = vector.multi_reduction <add>, %160, %cst_164 [1] : vector<1x10xf32> to vector<1xf32>
    %162 = vector.shape_cast %161 : vector<1xf32> to vector<1x1xf32>
    %163 = math.log %162 : vector<1x1xf32>
    %164 = vector.broadcast %163 : vector<1x1xf32> to vector<1x10xf32>
    %165 = arith.subf %159, %164 : vector<1x10xf32>
    %c0_165 = arith.constant 0 : index
    %c0_166 = arith.constant 0 : index
    %c0_167 = arith.constant 0 : index
    %166 = vector.load %arg20[%c0_165, %c0_166, %c0_167] : memref<1x1x10xf32, #tpu.memory_space<vmem>>, vector<1x1x10xf32>
    %167 = vector.shape_cast %166 : vector<1x1x10xf32> to vector<1x10xf32>
    %168 = vector.shape_cast %165 : vector<1x10xf32> to vector<1x1x10xf32>
    tpu.vector_store %arg20[%c0_165, %c0_166, %c0_167], %168 {strides = array<i32>} : memref<1x1x10xf32, #tpu.memory_space<vmem>>, vector<1x1x10xf32>,
    return
  }
  func.func @transform_0(%arg0: i32) -> (i32, i32, i32, i32) {
    %c0_i32 = arith.constant 0 : i32
    %c0_i32_0 = arith.constant 0 : i32
    %c0_i32_1 = arith.constant 0 : i32
    %c0_i32_2 = arith.constant 0 : i32
    return %arg0, %c0_i32, %c0_i32_0, %c0_i32_1 : i32, i32, i32, i32
  }
  func.func @transform_1(%arg0: i32) -> (i32, i32, i32) {
    %c0_i32 = arith.constant 0 : i32
    %c0_i32_0 = arith.constant 0 : i32
    %c0_i32_1 = arith.constant 0 : i32
    %c0_i32_2 = arith.constant 0 : i32
    return %c0_i32, %c0_i32_0, %c0_i32_1 : i32, i32, i32
  }
  func.func @transform_2(%arg0: i32) -> (i32, i32, i32) {
    %c0_i32 = arith.constant 0 : i32
    %c0_i32_0 = arith.constant 0 : i32
    %c0_i32_1 = arith.constant 0 : i32
    %c0_i32_2 = arith.constant 0 : i32
    return %c0_i32, %c0_i32_0, %c0_i32_1 : i32, i32, i32
  }
  func.func @transform_3(%arg0: i32) -> (i32, i32) {
    %c0_i32 = arith.constant 0 : i32
    %c0_i32_0 = arith.constant 0 : i32
    %c0_i32_1 = arith.constant 0 : i32
    return %c0_i32, %c0_i32_0 : i32, i32
  }
  func.func @transform_4(%arg0: i32) -> (i32, i32) {
    %c0_i32 = arith.constant 0 : i32
    %c0_i32_0 = arith.constant 0 : i32
    %c0_i32_1 = arith.constant 0 : i32
    return %c0_i32, %c0_i32_0 : i32, i32
  }
  func.func @transform_5(%arg0: i32) -> (i32, i32) {
    %c0_i32 = arith.constant 0 : i32
    %c0_i32_0 = arith.constant 0 : i32
    %c0_i32_1 = arith.constant 0 : i32
    return %c0_i32, %c0_i32_0 : i32, i32
  }
  func.func @transform_6(%arg0: i32) -> (i32, i32) {
    %c0_i32 = arith.constant 0 : i32
    %c0_i32_0 = arith.constant 0 : i32
    %c0_i32_1 = arith.constant 0 : i32
    return %c0_i32, %c0_i32_0 : i32, i32
  }
  func.func @transform_7(%arg0: i32) -> (i32, i32) {
    %c0_i32 = arith.constant 0 : i32
    %c0_i32_0 = arith.constant 0 : i32
    %c0_i32_1 = arith.constant 0 : i32
    return %c0_i32, %c0_i32_0 : i32, i32
  }
  func.func @transform_8(%arg0: i32) -> (i32, i32, i32) {
    %c0_i32 = arith.constant 0 : i32
    %c0_i32_0 = arith.constant 0 : i32
    %c0_i32_1 = arith.constant 0 : i32
    %c0_i32_2 = arith.constant 0 : i32
    return %c0_i32, %c0_i32_0, %c0_i32_1 : i32, i32, i32
  }
  func.func @transform_9(%arg0: i32) -> (i32, i32, i32) {
    %c0_i32 = arith.constant 0 : i32
    %c0_i32_0 = arith.constant 0 : i32
    %c0_i32_1 = arith.constant 0 : i32
    %c0_i32_2 = arith.constant 0 : i32
    return %c0_i32, %c0_i32_0, %c0_i32_1 : i32, i32, i32
  }
  func.func @transform_10(%arg0: i32) -> (i32, i32) {
    %c0_i32 = arith.constant 0 : i32
    %c0_i32_0 = arith.constant 0 : i32
    %c0_i32_1 = arith.constant 0 : i32
    return %c0_i32, %c0_i32_0 : i32, i32
  }
  func.func @transform_11(%arg0: i32) -> (i32, i32) {
    %c0_i32 = arith.constant 0 : i32
    %c0_i32_0 = arith.constant 0 : i32
    %c0_i32_1 = arith.constant 0 : i32
    return %c0_i32, %c0_i32_0 : i32, i32
  }
  func.func @transform_12(%arg0: i32) -> (i32, i32) {
    %c0_i32 = arith.constant 0 : i32
    %c0_i32_0 = arith.constant 0 : i32
    %c0_i32_1 = arith.constant 0 : i32
    return %c0_i32, %c0_i32_0 : i32, i32
  }
  func.func @transform_13(%arg0: i32) -> (i32, i32, i32) {
    %c0_i32 = arith.constant 0 : i32
    %c0_i32_0 = arith.constant 0 : i32
    %c0_i32_1 = arith.constant 0 : i32
    %c0_i32_2 = arith.constant 0 : i32
    return %c0_i32, %c0_i32_0, %c0_i32_1 : i32, i32, i32
  }
  func.func @transform_14(%arg0: i32) -> (i32, i32, i32) {
    %c0_i32 = arith.constant 0 : i32
    %c0_i32_0 = arith.constant 0 : i32
    %c0_i32_1 = arith.constant 0 : i32
    %c0_i32_2 = arith.constant 0 : i32
    return %c0_i32, %c0_i32_0, %c0_i32_1 : i32, i32, i32
  }
  func.func @transform_15(%arg0: i32) -> (i32, i32, i32) {
    %c0_i32 = arith.constant 0 : i32
    %c0_i32_0 = arith.constant 0 : i32
    %c0_i32_1 = arith.constant 0 : i32
    %c0_i32_2 = arith.constant 0 : i32
    return %c0_i32, %c0_i32_0, %c0_i32_1 : i32, i32, i32
  }
  func.func @transform_16(%arg0: i32) -> (i32, i32) {
    %c0_i32 = arith.constant 0 : i32
    %c0_i32_0 = arith.constant 0 : i32
    %c0_i32_1 = arith.constant 0 : i32
    return %c0_i32, %c0_i32_0 : i32, i32
  }
  func.func @transform_17(%arg0: i32) -> (i32, i32) {
    %c0_i32 = arith.constant 0 : i32
    %c0_i32_0 = arith.constant 0 : i32
    %c0_i32_1 = arith.constant 0 : i32
    return %c0_i32, %c0_i32_0 : i32, i32
  }
  func.func @transform_18(%arg0: i32) -> (i32, i32) {
    %c0_i32 = arith.constant 0 : i32
    %c0_i32_0 = arith.constant 0 : i32
    %c0_i32_1 = arith.constant 0 : i32
    return %c0_i32, %c0_i32_0 : i32, i32
  }
  func.func @transform_19(%arg0: i32) -> (i32, i32, i32) {
    %c0_i32 = arith.constant 0 : i32
    %c0_i32_0 = arith.constant 0 : i32
    %c0_i32_1 = arith.constant 0 : i32
    return %arg0, %c0_i32, %c0_i32_0 : i32, i32, i32
  }
}

</mosaic_0001>

<bundles_post_ra>
// kernel: net_forward.1
= control target key start
LH: loop header
LB: loop body
LE: loop exit
PB: predicated region body
PF: predicated region fallthrough
CT: control target
= control target key end

     0   :  { %s7286_s0 = inlined_call_operand.vmem [shape: f32[2,1,28,28], index: 0, kind: input, shape index: {}]   ;;  %s7287_s1 = inlined_call_operand.vmem [shape: f32[5,24,28], index: 1, kind: input, shape index: {}]   ;;  %s7288_s2 = inlined_call_operand.vmem [shape: f32[5,28,240], index: 2, kind: input, shape index: {}]   ;;  %s7289_s3 = inlined_call_operand.vmem [shape: f32[1,240], index: 3, kind: input, shape index: {}]   ;;  %s7290_s4 = inlined_call_operand.vmem [shape: f32[240,120], index: 4, kind: input, shape index: {}]   ;;  %s7291_s5 = inlined_call_operand.vmem [shape: f32[240,120], index: 5, kind: input, shape index: {}]   ;;  %s7292_s6 = inlined_call_operand.vmem [shape: f32[12,24], index: 6, kind: input, shape index: {}]   ;;  %s7293_s7 = inlined_call_operand.vmem [shape: f32[12,24], index: 7, kind: input, shape index: {}]   ;;  %s7294_s8 = inlined_call_operand.vmem [shape: f32[5,8,12], index: 8, kind: input, shape index: {}]   ;;  %s7295_s9 = inlined_call_operand.vmem [shape: f32[5,120,160], index: 9, kind: input, shape index: {}]   ;;  %s7296_s10 = inlined_call_operand.vmem [shape: f32[1,160], index: 10, kind: input, shape index: {}]   ;;  %s7297_s11 = inlined_call_operand.vmem [shape: f32[160,80], index: 11, kind: input, shape index: {}]   ;;  %s7298_s12 = inlined_call_operand.vmem [shape: f32[160,80], index: 12, kind: input, shape index: {}]   ;;  %s7299_s13 = inlined_call_operand.vmem [shape: f32[4,1,8], index: 13, kind: input, shape index: {}]   ;;  %s7300_s14 = inlined_call_operand.vmem [shape: f32[4,1,8], index: 14, kind: input, shape index: {}]   ;;  %s7301_s15 = inlined_call_operand.vmem [shape: f32[4,80,50], index: 15, kind: input, shape index: {}]   ;;  %s7302_s16 = inlined_call_operand.vmem [shape: f32[1,50], index: 16, kind: input, shape index: {}]   ;;  %s7303_s17 = inlined_call_operand.vmem [shape: f32[50,10], index: 17, kind: input, shape index: {}]   ;;  %s7304_s18 = inlined_call_operand.vmem [shape: f32[1,10], index: 18, kind: input, shape index: {}]   ;;  %s7305_s19 = inlined_call_operand.hbm [shape: f32[2,1,10], index: 19, kind: output, shape index: {}]  }
   0x1   :  { %7316 = sst [smem:[#allocation11_spill]] %s7286_s0 }
   0x2   :  { %7317 = sst [smem:[#allocation12_spill]] %s7287_s1 }
   0x3   :  { %7318 = sst [smem:[#allocation13_spill]] %s7288_s2 }
   0x4   :  { %7319 = sst [smem:[#allocation14_spill]] %s7289_s3 }
   0x5   :  { %7320 = sst [smem:[#allocation15_spill]] %s7305_s19 }
   0x6   :  { %24 = vsyncpa [#allocation3], 0 }
   0x7   :  { %26 = vsyncpa [#allocation3 + $0x1], 0  ;;  %s5714_s0 = smov 0   ;;  %s5716_s30 = smov 0  }
   0x8   :  { %s5718_s20 = smov 0   ;;  %s5720_s21 = smov 0  }
   0x9 LB: > { %7321 = sst [smem:[#allocation5_spill]] %s5595_s0  ;;  %s5735_s1 = sadd.s32 4294967295, %s5607_s21   ;;  %s5607_s21 = sphi %s5720_s21, %s7340_s21   ;;  %s5603_s20 = sphi %s5718_s20, %s7342_s20   ;;  %s5599_s30 = sphi %s5716_s30, %s7344_s30   ;;  %s5595_s0 = sphi %s5714_s0, %s7343_s0  }
   0xa   : > { %7322 = sst [smem:[#allocation6_spill]] %s5603_s20  ;;  %s4272_s22 = sadd.s32 4294967294, %s5607_s21  }
   0xb   : > { %7323 = sst [smem:[#allocation7_spill]] %s5607_s21  ;;  %s5739_s2 = sadd.s32 1, %s5607_s21  }
   0xc   : > { %7324 = sst [smem:[#allocation8_spill]] %s5739_s2  ;;  %s443_s23 = sadd.s32 1, %s5603_s20 }
   0xd   : > { %s440_s24 = ssub.s32 %s5607_s21, %s5739_s2  ;;  %p453_p0 = scmp.ne.s32.totalorder %s5603_s20, %s5599_s30 }
   0xe   : > { %p441_p1 = scmp.eq.s32.totalorder %s440_s24, 0  ;;  %p454_p2 = scmp.eq.s32.totalorder %s5735_s1, 1 }
   0xf   : > { %p459_p3 = scmp.ne.s32.totalorder %s5599_s30, %s5595_s0  ;;  %p460_p4 = scmp.eq.s32.totalorder %s4272_s22, 1 }
  0x10   : > { %s5750_s25 = scalar_select %p441_p1, %s5603_s20, %s443_s23  }
  0x11   : > { %p5752_p5 = por %p454_p2, %p453_p0  ;;  %p5756_p6 = por %p460_p4, %p459_p3 }
  0x12   : > { %7325 = sst [smem:[#allocation9_spill]] %s5750_s25  ;;  %p4275_p7 = scmp.ge.s32.totalorder %s5607_s21, 1 }
  0x13   : > { %s7327_s26 = scalar_select %p5756_p6, 1, 0 }
  0x14   : > { %p540_p8 = scmp.lt.s32.totalorder %s5607_s21, 3 }
  0x15   : > { %7328 = sst [smem:[#allocation10_spill]] %s7327_s26 }
  0x16   : > { %p541_p9 = pnand %p4275_p7, %p540_p8 }
  0x17   : > { %p595_p10 = scmp.lt.s32.totalorder (!%p541_p9), %s5735_s1, 1  ;;  %v5609_v0 = vmov (!%p541_p9), 0.0|0.0   ;;  %vm5610_vm0 = vmmov (!%p541_p9), 0   ;;  %v5611_v1 = vmov (!%p541_p9), 0.0   ;;  %s7329_s23 = sld [smem:[#allocation11_spill]] (!%p541_p9)  ;;  %vm617_vm1 = vcmask (!%p541_p9), 1043456  }
  0x18   : > { %544 = sbr.rel (%p541_p9) target bundleno = 3242 (0xcaa), region = 96  ;;  %4987 = vmatprep.subr.bf16.mxu0 (!%p541_p9), %v5609_v0  ;;  %5021 = vmatprep.subr.bf16.mxu1 (!%p541_p9), %v5609_v0  ;;  %vm5612_vm2 = vmmov (!%p541_p9), 1   ;;  %s7332_s29 = sld [smem:[#allocation12_spill]] (!%p541_p9)  ;;  %vm607_vm4 = vcmask (!%p541_p9), 228352   ;;  %v1643_v39 = vld [vmem:[%s7290_s4] sm:$0xff] (!%p541_p9)  ;;  %v1644_v40 = vld [vmem:[%s7290_s4 + $0x8] sm:$0xff] (!%p541_p9) }
  0x19   : > { %4708 = vmatprep.mubr.msk.f32.mxu0 (!%p541_p9), %vm5610_vm0, %v5611_v1  ;;  %4742 = vmatprep.mubr.msk.f32.mxu1 (!%p541_p9), %vm5610_vm0, %v5611_v1  ;;  %vm5774_vm3 = vmpackc.low (!%p541_p9), %vm617_vm1, %vm5612_vm2  ;;  %s7333_s20 = sld [smem:[#allocation13_spill]] (!%p541_p9)  ;;  %v5073_v41 = vpack.c.bf16 (!%p541_p9), %v1644_v40, %v1643_v39  ;;  %v1645_v42 = vld [vmem:[%s7290_s4 + $0x10] sm:$0xff] (!%p541_p9)  ;;  %v1646_v43 = vld [vmem:[%s7290_s4 + $0x18] sm:$0xff] (!%p541_p9)  ;;  %s7335_s22 = sld [smem:[#allocation14_spill]] (!%p541_p9)  ;;  %vm1673_vm5 = vcmask (!%p541_p9), 916480   ;;  %vm1878_vm6 = vcmask (!%p541_p9), 195584  }
  0x1a   : > { %v5076_v44 = vpack.c.bf16 (!%p541_p9), %v1646_v43, %v1645_v42  ;;  %v1647_v45 = vld [vmem:[%s7290_s4 + $0x20] sm:$0xff] (!%p541_p9)  ;;  %v1648_v46 = vld [vmem:[%s7290_s4 + $0x28] sm:$0xff] (!%p541_p9)  ;;  %v1649_v48 = vld [vmem:[%s7290_s4 + $0x30] sm:$0xff] (!%p541_p9)  ;;  %vm2048_vm7 = vcmask (!%p541_p9), 97280   ;;  %vm2261_vm8 = vcmask (!%p541_p9), 982016   ;;  %vm2990_vm9 = vcmask (!%p541_p9), 261120  }
  0x1b   : > { %v5079_v47 = vpack.c.bf16 (!%p541_p9), %v1648_v46, %v1647_v45  ;;  %v1650_v49 = vld [vmem:[%s7290_s4 + $0x38] sm:$0xff] (!%p541_p9)  ;;  %v1651_v51 = vld [vmem:[%s7290_s4 + $0x40] sm:$0xff] (!%p541_p9)  ;;  %v1652_v52 = vld [vmem:[%s7290_s4 + $0x48] sm:$0xff] (!%p541_p9)  ;;  %vm3157_vm10 = vcmask (!%p541_p9), 64512   ;;  %vm3317_vm11 = vcmask (!%p541_p9), 654336   ;;  %vm4116_vm12 = vcmask (!%p541_p9), 1041408  }
  0x1c   : > { %v5082_v50 = vpack.c.bf16 (!%p541_p9), %v1650_v49, %v1649_v48  ;;  %v5085_v53 = vpack.c.bf16 (!%p541_p9), %v1652_v52, %v1651_v51  ;;  %v1653_v54 = vld [vmem:[%s7290_s4 + $0x50] sm:$0xff] (!%p541_p9)  ;;  %v1654_v55 = vld [vmem:[%s7290_s4 + $0x58] sm:$0xff] (!%p541_p9)  ;;  %v1655_v57 = vld [vmem:[%s7290_s4 + $0x60] sm:$0xff] (!%p541_p9)  ;;  %vm4112_vm13 = vcmask (!%p541_p9), 408576   ;;  %vm4190_vm14 = vcmask (!%p541_p9), 73728   ;;  %s593_s26 = sand.u32 (!%p541_p9), 1, %s5599_s30  }
  0x1d   : > { %v5088_v56 = vpack.c.bf16 (!%p541_p9), %v1654_v55, %v1653_v54  ;;  %v1656_v58 = vld [vmem:[%s7290_s4 + $0x68] sm:$0xff] (!%p541_p9)  ;;  %v1657_v60 = vld [vmem:[%s7290_s4 + $0x70] sm:$0xff] (!%p541_p9)  ;;  %v1658_v61 = vld [vmem:[%s7290_s4 + $0x78] sm:$0xff] (!%p541_p9)  ;;  %s7336_s25 = sld [smem:[#allocation15_spill]] (!%p541_p9) }
  0x1e   : > { %v604_v9 = vld [vmem:[%s7332_s29] sm:$0xff] (!%p541_p9)  ;;  %v4307_v10 = vld [vmem:[%s7332_s29 + $0x30] sm:$0xff] (!%p541_p9)  ;;  %v605_v11 = vld [vmem:[%s7332_s29 + $0x8] sm:$0xff] (!%p541_p9)  ;;  %v5091_v59 = vpack.c.bf16 (!%p541_p9), %v1656_v58, %v1655_v57  ;;  %v5094_v62 = vpack.c.bf16 (!%p541_p9), %v1658_v61, %v1657_v60 }
  0x1f   : > { %s596_s27 = scalar_select %p595_p10, %s5735_s1, 1  ;;  %v4308_v12 = vld [vmem:[%s7332_s29 + $0x38] sm:$0xff]  ;;  %v606_v13 = vld [vmem:[%s7332_s29 + $0x10] sm:$0xff]  ;;  %v4309_v14 = vld [vmem:[%s7332_s29 + $0x40] sm:$0xff] }
  0x20   : > { %v4282_v15 = vld [vmem:[%s7332_s29 + $0x18] sm:$0xff]  ;;  %v4327_v16 = vld [vmem:[%s7332_s29 + $0x48] sm:$0xff]  ;;  %v4283_v17 = vld [vmem:[%s7332_s29 + $0x20] sm:$0xff]  ;;  %s7334_s2 = smov %s7333_s20 }
  0x21   : > { %s4571_s28 = sshll.u32 %s596_s27, 5  ;;  %v4328_v18 = vld [vmem:[%s7332_s29 + $0x50] sm:$0xff]  ;;  %v4284_v19 = vld [vmem:[%s7332_s29 + $0x28] sm:$0xff]  ;;  %v4329_v20 = vld [vmem:[%s7332_s29 + $0x58] sm:$0xff] }
  0x22   : > { %s599_s24 = scalar_lea.vmem %s7329_s23, %s4571_s28  ;;  %v4347_v21 = vld [vmem:[%s7332_s29 + $0x60] sm:$0xff]  ;;  %v4348_v22 = vld [vmem:[%s7332_s29 + $0x68] sm:$0xff]  ;;  %v4349_v23 = vld [vmem:[%s7332_s29 + $0x70] sm:$0xff]  ;;  %s4568_s28 = sshll.u32 %s5735_s1, 4 }
  0x23   : > { %v600_v2 = vld [vmem:[%s599_s24] sm:$0xff]  ;;  %v601_v3 = vld [vmem:[%s599_s24 + $0x8] sm:$0xff]  ;;  %v602_v4 = vld [vmem:[%s599_s24 + $0x10] sm:$0xff]  ;;  %s5613_s1 = smov [#allocation2]  }
  0x24   : > { %v4988_v5 = vpack.c.bf16 %v601_v3, %v600_v2  ;;  %v603_v6 = vld [vmem:[%s599_s24 + $0x18] sm:$0xf]  ;;  %v4290_v24 = vld [vmem:[%s7333_s20 + $0x48] sm:$0xff]  ;;  %v4289_v27 = vld [vmem:[%s7334_s2 + $0x40] sm:$0xff]  ;;  %s7243_s24 = scalar_lea.hbm %s7336_s25, %s4568_s28  ;;  %s4205_s20 = scalar_lea.sflag [#allocation3], %s593_s26 }
  0x25   : > { %v4991_v7 = vpack.c.bf16 %v603_v6, %v602_v4  ;;  %v4292_v25 = vld [vmem:[%s7334_s2 + $0x58] sm:$0xff]  ;;  %v4291_v28 = vld [vmem:[%s7334_s2 + $0x50] sm:$0xff]  ;;  %v4294_v30 = vld [vmem:[%s7334_s2 + $0x68] sm:$0xff]  ;;  %s5549_s0 = sshll.u32 %s5613_s1, 4  ;;  %s5550_s0 = int_to_ptr.vmem [resolvable:$false] %s5549_s0 }
  0x26   : > { %4989 = vmatpush3.bf16.msra.mxu0 %v4988_v5  ;;  %5023 = vmatpush3.bf16.msra.mxu1 %v4988_v5  ;;  %v5001_v26 = vpack.c.bf16 %v4292_v25, %v4290_v24  ;;  %v5003_v29 = vpack.c.bf16 %v4291_v28, %v4289_v27  ;;  %v4296_v31 = vld [vmem:[%s7334_s2 + $0x78] sm:$0xf]  ;;  %v4293_v33 = vld [vmem:[%s7334_s2 + $0x60] sm:$0xff]  ;;  %v4295_v34 = vld [vmem:[%s7334_s2 + $0x70] sm:$0xf] }
  0x27   : > { %4990 = vmatprep.subr.bf16.mxu0 %v5609_v0  ;;  %5024 = vmatprep.subr.bf16.mxu1 %v5609_v0  ;;  %v5005_v32 = vpack.c.bf16 %v4296_v31, %v4294_v30  ;;  %v5008_v35 = vpack.c.bf16 %v4295_v34, %v4293_v33  ;;  %v702_v36 = vld [vmem:[%s7334_s2 + $0x8] sm:$0xff]  ;;  %v704_v37 = vld [vmem:[%s7334_s2 + $0x18] sm:$0xff]  ;;  %v1659_v63 = vld [vmem:[%s7290_s4 + $0x80] sm:$0xff] }
  0x28   : > { %v5011_v38 = vpack.c.bf16 %v704_v37, %v702_v36  ;;  %v1660_v2 = vld [vmem:[%s7290_s4 + $0x88] sm:$0xff]  ;;  %v1661_v4 = vld [vmem:[%s7290_s4 + $0x90] sm:$0xff]  ;;  %v701_v28 = vld [vmem:[%s7334_s2] sm:$0xff] }
  0x29   : > { %v5097_v3 = vpack.c.bf16 %v1660_v2, %v1659_v63  ;;  %v706_v31 = vld [vmem:[%s7334_s2 + $0x28] sm:$0xff]  ;;  %v707_v39 = vld [vmem:[%s7334_s2 + $0x30] sm:$0xf]  ;;  %v4317_v42 = vld [vmem:[%s7334_s2 + $0x98] sm:$0xff] }
  0x2a   : > { %4993 = vmatpush3.bf16.msk.msra.mxu0 %vm5774_vm3, %v4991_v7  ;;  %5027 = vmatpush3.bf16.msk.msra.mxu1 %vm5774_vm3, %v4991_v7  ;;  %v4314_v52 = vld [vmem:[%s7334_s2 + $0x80] sm:$0xff]  ;;  %v4319_v55 = vld [vmem:[%s7334_s2 + $0xa8] sm:$0xff]  ;;  %v4320_v63 = vld [vmem:[%s7334_s2 + $0xb0] sm:$0xf] }
  0x2b   : > { %4994 = vmatprep.subr.bf16.mxu0 %v5609_v0  ;;  %5038 = vmatprep.subr.bf16.mxu1 %v5609_v0  ;;  %v4335_v2 = vld [vmem:[%s7334_s2 + $0xc8] sm:$0xff]  ;;  %v4410_v8 = vld [vmem:[%s7295_s9 + $0x1d0] sm:$0xff] }
  0x2d   : > { %4709 = vmatmul.mubr.msk.f32.vlgmr.msra.gmra.mrb[0].mxu0 %vm607_vm4, %v604_v9  ;;  %4743 = vmatmul.mubr.msk.f32.vlgmr.msra.gmra.mrb[0].mxu1 %vm607_vm4, %v4307_v10  ;;  %v1664_v9 = vld [vmem:[%s7290_s4 + $0xa8] sm:$0xff] }
  0x2e   : > { %4711 = vmatprep.mubr.msk.f32.mxu0 %vm5610_vm0, %v5611_v1  ;;  %4996 = vmatpush3.bf16.msra.mxu0 %v4988_v5 }
  0x2f   : > { %4997 = vmatprep.subr.bf16.mxu0 %v5609_v0  ;;  %4745 = vmatprep.mubr.msk.f32.mxu1 %vm5610_vm0, %v5611_v1 }
  0x30   : > { %5040 = vmatpush3.bf16.msra.mxu1 %v4988_v5 }
  0x31   : > { %4712 = vmatmul.mubr.msk.f32.gmra.mrb[2].mxu0 %vm607_vm4, %v605_v11  ;;  %4746 = vmatmul.mubr.msk.f32.gmra.mrb[2].mxu1 %vm607_vm4, %v4308_v12  ;;  %v1665_v11 = vld [vmem:[%s7290_s4 + $0xb0] sm:$0xff]  ;;  %v1666_v12 = vld [vmem:[%s7290_s4 + $0xb8] sm:$0xff] }
  0x32   : > { %4714 = vmatprep.mubr.msk.f32.mxu0 %vm5610_vm0, %v5611_v1  ;;  %5000 = vmatpush3.bf16.msk.msra.mxu0 %vm5774_vm3, %v4991_v7 }
  0x33   : > { %4748 = vmatprep.mubr.msk.f32.mxu1 %vm5610_vm0, %v5611_v1  ;;  %5041 = vmatprep.subr.bf16.mxu1 %v5609_v0 }
  0x34   : > { %5044 = vmatpush3.bf16.msk.msra.mxu1 %vm5774_vm3, %v4991_v7  ;;  %5002 = vmatprep.subr.bf16.mxu0 %v5001_v26 }
  0x35   : > { %4715 = vmatmul.mubr.msk.f32.gmra.mrb[4].mxu0 %vm607_vm4, %v606_v13  ;;  %4749 = vmatmul.mubr.msk.f32.gmra.mrb[4].mxu1 %vm607_vm4, %v4309_v14  ;;  %v5106_v13 = vpack.c.bf16 %v1666_v12, %v1665_v11  ;;  %v1667_v14 = vld [vmem:[%s7290_s4 + $0xc0] sm:$0xff]  ;;  %v4336_v12 = vld [vmem:[%s7334_s2 + $0xd0] sm:$0xff] }
  0x36   : > { %4725 = vmatprep.mubr.msk.f32.mxu0 %vm5610_vm0, %v5611_v1  ;;  %4759 = vmatprep.mubr.msk.f32.mxu1 %vm5610_vm0, %v5611_v1  ;;  %v4334_v11 = vld [vmem:[%s7334_s2 + $0xc0] sm:$0xff] }
  0x37   : > { %5055 = vmatprep.subr.bf16.mxu1 %v5609_v0 }
  0x39   : > { %4726 = vmatmul.mubr.msk.f32.vlgmr.msra.gmra.mrb[6].mxu0 %vm607_vm4, %v4282_v15  ;;  %4760 = vmatmul.mubr.msk.f32.vlgmr.msra.gmra.mrb[6].mxu1 %vm607_vm4, %v4327_v16  ;;  %v1668_v15 = vld [vmem:[%s7290_s4 + $0xc8] sm:$0xff] }
  0x3a   : > { %4728 = vmatprep.mubr.msk.f32.mxu0 %vm5610_vm0, %v5611_v1  ;;  %4762 = vmatprep.mubr.msk.f32.mxu1 %vm5610_vm0, %v5611_v1  ;;  %v5109_v16 = vpack.c.bf16 %v1668_v15, %v1667_v14  ;;  %v4341_v14 = vld [vmem:[%s7334_s2 + $0xf8] sm:$0xf] }
  0x3b   : > { %5057 = vmatpush3.bf16.msra.mxu1 %v4988_v5  ;;  %5004 = vmatpush1.bf16.msra.mxu0 %v5003_v29  ;;  %v1662_v5 = vld [vmem:[%s7290_s4 + $0x98] sm:$0xff]  ;;  %v703_v29 = vld [vmem:[%s7334_s2 + $0x10] sm:$0xff] }
  0x3c   : > { %5058 = vmatprep.subr.bf16.mxu1 %v5609_v0  ;;  %5007 = vmatprep.subr.msk.bf16.mxu0 %vm5774_vm3, %v5005_v32  ;;  %v5100_v6 = vpack.c.bf16 %v1662_v5, %v1661_v4  ;;  %v708_v32 = vld [vmem:[%s7334_s2 + $0x38] sm:$0xf]  ;;  %v5013_v36 = vpack.c.bf16 %v703_v29, %v701_v28  ;;  %v4359_v28 = vld [vmem:[%s7334_s2 + $0x128] sm:$0xff] }
  0x3d   : > { %4729 = vmatmul.mubr.msk.f32.gmra.mrb[8].mxu0 %vm607_vm4, %v4283_v17  ;;  %4763 = vmatmul.mubr.msk.f32.gmra.mrb[8].mxu1 %vm607_vm4, %v4328_v18  ;;  %v1669_v17 = vld [vmem:[%s7290_s4 + $0xd0] sm:$0xff]  ;;  %v1670_v18 = vld [vmem:[%s7290_s4 + $0xd8] sm:$0xff]  ;;  %v5015_v37 = vpack.c.bf16 %v708_v32, %v706_v31  ;;  %v4358_v31 = vld [vmem:[%s7334_s2 + $0x120] sm:$0xff] }
  0x3e   : > { %4731 = vmatprep.mubr.msk.f32.mxu0 %vm5610_vm0, %v5611_v1  ;;  %4765 = vmatprep.mubr.msk.f32.mxu1 %vm5610_vm0, %v5611_v1  ;;  %v4360_v32 = vld [vmem:[%s7334_s2 + $0x130] sm:$0xf] }
  0x3f   : > { %5061 = vmatpush3.bf16.msk.msra.mxu1 %vm5774_vm3, %v4991_v7  ;;  %5010 = vmatpush1.bf16.msk.msra.mxu0 %vm5774_vm3, %v5008_v35  ;;  %v1663_v7 = vld [vmem:[%s7290_s4 + $0xa0] sm:$0xff] }
  0x40   : > { %5072 = vmatprep.subr.bf16.mxu1 %v5609_v0  ;;  %5012 = vmatprep.subr.bf16.mxu0 %v5011_v38  ;;  %v5103_v10 = vpack.c.bf16 %v1664_v9, %v1663_v7  ;;  %v705_v38 = vld [vmem:[%s7334_s2 + $0x20] sm:$0xff] }
  0x41   : > { %4732 = vmatmul.mubr.msk.f32.gmra.mrb[10].mxu0 %vm607_vm4, %v4284_v19  ;;  %4766 = vmatmul.mubr.msk.f32.gmra.mrb[10].mxu1 %vm607_vm4, %v4329_v20  ;;  %v5112_v19 = vpack.c.bf16 %v1670_v18, %v1669_v17  ;;  %v5018_v46 = vpack.c.bf16 %v707_v39, %v705_v38  ;;  %v5047_v17 = vpack.c.bf16 %v4336_v12, %v4334_v11  ;;  %v1766_v38 = vld [vmem:[%s7291_s5 + $0x18] sm:$0xff]  ;;  %v1789_v12 = vld [vmem:[%s7291_s5 + $0xd0] sm:$0xff] }
  0x42   : > { %4776 = vmatprep.mubr.msk.f32.mxu1 %vm5610_vm0, %v5611_v1  ;;  %890 = vmatprep.mubr.f32.mxu0 %v5611_v1 }
  0x45   : > { %4777 = vmatmul.mubr.msk.f32.vlgmr.msra.gmra.mrb[12].mxu1 %vm607_vm4, %v4347_v21 }
  0x46   : > { %4779 = vmatprep.mubr.msk.f32.mxu1 %vm5610_vm0, %v5611_v1  ;;  %5074 = vmatpush1.bf16.msra.mxu1 %v5073_v41  ;;  %v4315_v41 = vld [vmem:[%s7334_s2 + $0x88] sm:$0xff] }
  0x47   : > { %5075 = vmatprep.subr.bf16.mxu1 %v5609_v0 }
  0x49   : > { %4780 = vmatmul.mubr.msk.f32.gmra.mrb[14].mxu1 %vm607_vm4, %v4348_v22 }
  0x4a   : > { %4782 = vmatprep.mubr.msk.f32.mxu1 %vm5610_vm0, %v5611_v1  ;;  %5077 = vmatpush1.bf16.msra.mxu1 %v5076_v44 }
  0x4b   : > { %5078 = vmatprep.subr.bf16.mxu1 %v5609_v0 }
  0x4d   : > { %4783 = vmatmul.mubr.msk.f32.gmra.mrb[16].mxu1 %vm607_vm4, %v4349_v23 }
  0x4e   : > { %5080 = vmatpush1.bf16.msra.mxu1 %v5079_v47  ;;  %v5028_v47 = vpack.c.bf16 %v4317_v42, %v4315_v41  ;;  %v1768_v41 = vld [vmem:[%s7291_s5 + $0x28] sm:$0xff] }
  0x4f   : > { %5081 = vmatprep.subr.bf16.mxu1 %v5609_v0 }
  0x52   : > { %5083 = vmatpush1.bf16.msra.mxu1 %v5082_v50 }
  0x53   : > { %5084 = vmatprep.subr.bf16.mxu1 %v5609_v0 }
  0x56   : > { %5086 = vmatpush1.bf16.msra.mxu1 %v5085_v53  ;;  %v4316_v53 = vld [vmem:[%s7334_s2 + $0x90] sm:$0xff] }
  0x57   : > { %5087 = vmatprep.subr.bf16.mxu1 %v5609_v0  ;;  %v5030_v60 = vpack.c.bf16 %v4316_v53, %v4314_v52  ;;  %v1775_v52 = vld [vmem:[%s7291_s5 + $0x60] sm:$0xff]  ;;  %v1776_v53 = vld [vmem:[%s7291_s5 + $0x68] sm:$0xff] }
  0x5a   : > { %5089 = vmatpush1.bf16.msra.mxu1 %v5088_v56  ;;  %v4321_v56 = vld [vmem:[%s7334_s2 + $0xb8] sm:$0xf] }
  0x5b   : > { %5090 = vmatprep.subr.bf16.mxu1 %v5609_v0  ;;  %v5032_v61 = vpack.c.bf16 %v4321_v56, %v4319_v55  ;;  %v1777_v55 = vld [vmem:[%s7291_s5 + $0x70] sm:$0xff]  ;;  %v1778_v56 = vld [vmem:[%s7291_s5 + $0x78] sm:$0xff] }
  0x5e   : > { %5092 = vmatpush1.bf16.msra.mxu1 %v5091_v59 }
  0x5f   : > { %5093 = vmatprep.subr.bf16.mxu1 %v5609_v0 }
  0x62   : > { %5095 = vmatpush1.bf16.msra.mxu1 %v5094_v62  ;;  %v4318_v62 = vld [vmem:[%s7334_s2 + $0xa0] sm:$0xff] }
  0x63   : > { %5096 = vmatprep.subr.bf16.mxu1 %v5609_v0 }
  0x66   : > { %5098 = vmatpush1.bf16.msra.mxu1 %v5097_v3  ;;  %v4337_v3 = vld [vmem:[%s7334_s2 + $0xd8] sm:$0xff] }
  0x67   : > { %5099 = vmatprep.subr.bf16.mxu1 %v5609_v0  ;;  %v5045_v7 = vpack.c.bf16 %v4337_v3, %v4335_v2  ;;  %v1783_v2 = vld [vmem:[%s7291_s5 + $0xa0] sm:$0xff]  ;;  %v1784_v3 = vld [vmem:[%s7291_s5 + $0xa8] sm:$0xff] }
  0x6a   : > { %5101 = vmatpush1.bf16.msra.mxu1 %v5100_v6  ;;  %v5035_v6 = vpack.c.bf16 %v4320_v63, %v4318_v62  ;;  %v1782_v62 = vld [vmem:[%s7291_s5 + $0x98] sm:$0xff] }
  0x6b   : > { %5102 = vmatprep.subr.bf16.mxu1 %v5609_v0 }
  0x6e   : > { %5104 = vmatpush1.bf16.msra.mxu1 %v5103_v10 }
  0x6f   : > { %5105 = vmatprep.subr.bf16.mxu1 %v5609_v0 }
  0x72   : > { %5107 = vmatpush1.bf16.msra.mxu1 %v5106_v13  ;;  %v4339_v13 = vld [vmem:[%s7334_s2 + $0xe8] sm:$0xff] }
  0x73   : > { %5108 = vmatprep.subr.bf16.mxu1 %v5609_v0  ;;  %v5049_v18 = vpack.c.bf16 %v4341_v14, %v4339_v13  ;;  %v1790_v13 = vld [vmem:[%s7291_s5 + $0xd8] sm:$0xff] }
  0x74   : > { %v5157_v14 = vpack.c.bf16 %v1790_v13, %v1789_v12 }
  0x76   : > { %5110 = vmatpush1.bf16.msra.mxu1 %v5109_v16 }
  0x77   : > { %5111 = vmatprep.subr.bf16.mxu1 %v5609_v0 }
  0x7a   : > { %5113 = vmatpush1.bf16.msra.mxu1 %v5112_v19  ;;  %v4338_v19 = vld [vmem:[%s7334_s2 + $0xe0] sm:$0xff] }
  0x7b   : > { %5114 = vmatprep.subr.bf16.mxu1 %v5609_v0 }
 0x100   : > { %v687_v20 = vpop.f32.mrb[0].mxu0  ;;  %v6015_v21 = vpop.f32.mrb[0].mxu1 }
 0x101   : > { %v4710_v22 = vpop.f32.mrb[1].mxu0  ;;  %v4744_v23 = vpop.f32.mrb[1].mxu1 }
 0x102   : > { %v4355_v22 = vld [vmem:[%s7334_s2 + $0x108] sm:$0xff]  ;;  %v4357_v23 = vld [vmem:[%s7334_s2 + $0x118] sm:$0xff] }
 0x104   : > { %v692_v24 = vpop.f32.mrb[2].mxu0  ;;  %v6017_v25 = vpop.f32.mrb[2].mxu1 }
 0x105   : > { %v4713_v26 = vpop.f32.mrb[3].mxu0  ;;  %v4747_v27 = vpop.f32.mrb[3].mxu1 }
 0x106   : > { %v5062_v26 = vpack.c.bf16 %v4357_v23, %v4355_v22  ;;  %v4356_v27 = vld [vmem:[%s7334_s2 + $0x110] sm:$0xff]  ;;  %v1627_v22 = vlaneseq }
 0x108   : > { %v6025_v30 = vpop.f32.mrb[4].mxu0  ;;  %v6033_v33 = vpop.f32.mrb[4].mxu1  ;;  %v6288_v23 = vshrl.u32 %v1627_v22, 7  ;;  %v4396_v22 = vld [vmem:[%s7295_s9 + $0x160] sm:$0xff] }
 0x109   : > { %v4716_v34 = vpop.f32.mrb[5].mxu0  ;;  %v4750_v35 = vpop.f32.mrb[5].mxu1 }
 0x10a   : > { %v5069_v34 = vpack.c.bf16 %v4360_v32, %v4358_v31  ;;  %v1764_v35 = vld [vmem:[%s7291_s5 + $0x8] sm:$0xff] }
 0x10c   : > { %v788_v40 = vpop.f32.mrb[6].mxu0  ;;  %v6047_v43 = vpop.f32.mrb[6].mxu1 }
 0x10d   : > { %v4727_v44 = vpop.f32.mrb[7].mxu0  ;;  %4299 = vmatmul.mubr.msk.f32.vlgmr.msra.gmra.mrb[12].mxu0 %vm607_vm4, %v788_v40  ;;  %v4761_v45 = vpop.f32.mrb[7].mxu1  ;;  %v1767_v40 = vld [vmem:[%s7291_s5 + $0x20] sm:$0xff] }
 0x10e   : > { %896 = vmatprep.mubr.f32.mxu0 %v5611_v1  ;;  %5014 = vmatpush1.bf16.msra.mxu0 %v5013_v36  ;;  %v5124_v42 = vpack.c.bf16 %v1768_v41, %v1767_v40  ;;  %v1770_v44 = vld [vmem:[%s7291_s5 + $0x38] sm:$0xff]  ;;  %v1876_v40 = vld [vmem:[%s7292_s6] sm:$0xff] }
 0x10f   : > { %5017 = vmatprep.subr.msk.bf16.mxu0 %vm5774_vm3, %v5015_v37  ;;  %v1765_v37 = vld [vmem:[%s7291_s5 + $0x10] sm:$0xff] }
 0x110   : > { %v793_v48 = vpop.f32.mrb[8].mxu0  ;;  %v6053_v49 = vpop.f32.mrb[8].mxu1  ;;  %v5121_v39 = vpack.c.bf16 %v1766_v38, %v1765_v37 }
 0x111   : > { %v4730_v50 = vpop.f32.mrb[9].mxu0  ;;  %4300 = vmatmul.mubr.msk.f32.gmra.mrb[14].mxu0 %vm607_vm4, %v793_v48  ;;  %v4764_v51 = vpop.f32.mrb[9].mxu1 }
 0x112   : > { %902 = vmatprep.mubr.f32.mxu0 %v5611_v1  ;;  %5020 = vmatpush1.bf16.msk.msra.mxu0 %vm5774_vm3, %v5018_v46  ;;  %v1771_v46 = vld [vmem:[%s7291_s5 + $0x40] sm:$0xff]  ;;  %v1774_v50 = vld [vmem:[%s7291_s5 + $0x58] sm:$0xff] }
 0x113   : > { %5029 = vmatprep.subr.bf16.mxu0 %v5028_v47  ;;  %v1772_v47 = vld [vmem:[%s7291_s5 + $0x48] sm:$0xff] }
 0x114   : > { %v798_v54 = vpop.f32.mrb[10].mxu0  ;;  %v6071_v57 = vpop.f32.mrb[10].mxu1  ;;  %v5130_v48 = vpack.c.bf16 %v1772_v47, %v1771_v46 }
 0x115   : > { %v4733_v58 = vpop.f32.mrb[11].mxu0  ;;  %4301 = vmatmul.mubr.msk.f32.gmra.mrb[16].mxu0 %vm607_vm4, %v798_v54  ;;  %v4767_v59 = vpop.f32.mrb[11].mxu1  ;;  %v5136_v54 = vpack.c.bf16 %v1776_v53, %v1775_v52 }
 0x116   : > { %988 = vmatprep.mubr.f32.mxu0 %v5611_v1  ;;  %v1779_v58 = vld [vmem:[%s7291_s5 + $0x80] sm:$0xff]  ;;  %v1780_v59 = vld [vmem:[%s7291_s5 + $0x88] sm:$0xff] }
 0x118   : > { %v6087_v4 = vpop.f32.mrb[12].mxu1 }
 0x119   : > { %4304 = vmatmul.mubr.msk.f32.vlgmr.msra.gmra.mrb[12].mxu0 %vm607_vm4, %v687_v20  ;;  %v4778_v5 = vpop.f32.mrb[13].mxu1  ;;  %v4340_v20 = vld [vmem:[%s7334_s2 + $0xf0] sm:$0xf] }
 0x11a   : > { %994 = vmatprep.mubr.f32.mxu0 %v5611_v1  ;;  %5031 = vmatpush1.bf16.msra.mxu0 %v5030_v60  ;;  %v5142_v60 = vpack.c.bf16 %v1780_v59, %v1779_v58  ;;  %v1785_v5 = vld [vmem:[%s7291_s5 + $0xb0] sm:$0xff]  ;;  %v1960_v58 = vld [vmem:[%s7293_s7] sm:$0xff]  ;;  %v1961_v59 = vld [vmem:[%s7293_s7 + $0x8] sm:$0xf] }
 0x11b   : > { %5034 = vmatprep.subr.msk.bf16.mxu0 %vm5774_vm3, %v5032_v61  ;;  %v1781_v61 = vld [vmem:[%s7291_s5 + $0x90] sm:$0xff] }
 0x11c   : > { %v6093_v9 = vpop.f32.mrb[14].mxu1  ;;  %v5145_v63 = vpack.c.bf16 %v1782_v62, %v1781_v61  ;;  %v4385_v61 = vld [vmem:[%s7295_s9 + $0x108] sm:$0xff]  ;;  %v4382_v62 = vld [vmem:[%s7295_s9 + $0xf0] sm:$0xff] }
 0x11d   : > { %4305 = vmatmul.mubr.msk.f32.gmra.mrb[14].mxu0 %vm607_vm4, %v692_v24  ;;  %v4781_v10 = vpop.f32.mrb[15].mxu1  ;;  %v5052_v24 = vpack.c.bf16 %v4340_v20, %v4338_v19  ;;  %v1792_v19 = vld [vmem:[%s7291_s5 + $0xe8] sm:$0xff] }
 0x11e   : > { %1000 = vmatprep.mubr.f32.mxu0 %v5611_v1  ;;  %5037 = vmatpush1.bf16.msk.msra.mxu0 %vm5774_vm3, %v5035_v6  ;;  %v1786_v6 = vld [vmem:[%s7291_s5 + $0xb8] sm:$0xff]  ;;  %v1788_v10 = vld [vmem:[%s7291_s5 + $0xc8] sm:$0xff] }
 0x11f   : > { %5046 = vmatprep.subr.bf16.mxu0 %v5045_v7  ;;  %v5151_v7 = vpack.c.bf16 %v1786_v6, %v1785_v5 }
 0x120   : > { %v1508_v15 = vpop.f32.mrb[16].mxu1 }
 0x121   : > { %4306 = vmatmul.mubr.msk.f32.gmra.mrb[16].mxu0 %vm607_vm4, %v6025_v30  ;;  %v4784_v16 = vpop.f32.mrb[17].mxu1 }
 0x122   : > { %1188 = vmatprep.mubr.f32.mxu0 %v5611_v1  ;;  %v1672_v16 = vld [vmem:[%s7290_s4 + $0xe8] sm:$0xff] }
 0x125   : > { %4324 = vmatmul.mubr.msk.f32.vlgmr.msra.gmra.mrb[12].mxu0 %vm607_vm4, %v6015_v21  ;;  %v4354_v21 = vld [vmem:[%s7334_s2 + $0x100] sm:$0xff] }
 0x126   : > { %1194 = vmatprep.mubr.f32.mxu0 %v5611_v1  ;;  %5048 = vmatpush1.bf16.msra.mxu0 %v5047_v17  ;;  %v5064_v29 = vpack.c.bf16 %v4356_v27, %v4354_v21  ;;  %v1791_v17 = vld [vmem:[%s7291_s5 + $0xe0] sm:$0xff]  ;;  %v1629_v21 = vsub.s32 0, %v6288_v23 }
 0x127   : > { %5051 = vmatprep.subr.msk.bf16.mxu0 %vm5774_vm3, %v5049_v18  ;;  %v5160_v20 = vpack.c.bf16 %v1792_v19, %v1791_v17  ;;  %v4397_v17 = vld [vmem:[%s7295_s9 + $0x168] sm:$0xff] }
 0x129   : > { %4325 = vmatmul.mubr.msk.f32.gmra.mrb[14].mxu0 %vm607_vm4, %v6017_v25  ;;  %v4361_v25 = vld [vmem:[%s7334_s2 + $0x138] sm:$0xf]  ;;  %s5551_s2 = scalar_lea.vmem %s5550_s0, 32 }
 0x12a   : > { %1200 = vmatprep.mubr.f32.mxu0 %v5611_v1  ;;  %5054 = vmatpush1.bf16.msk.msra.mxu0 %vm5774_vm3, %v5052_v24  ;;  %v5066_v30 = vpack.c.bf16 %v4361_v25, %v4359_v28  ;;  %v1633_v24 = vsub.s32 1, %v6288_v23  ;;  %v3067_v23 = vld [vmem:[%s7298_s12 + $0x18] sm:$0xff] }
 0x12b   : > { %5063 = vmatprep.subr.bf16.mxu0 %v5062_v26  ;;  %v1625_v26 = vld [vmem:[%s7335_s22] sm:$0x3]  ;;  %s594_s22 = scalar_lea.vmem [#allocation2], %s593_s26 }
 0x12c   : > { %v1634_v27 = vrot.slane %v1625_v26, %v1633_v24  ;;  %v1630_v28 = vrot.slane %v1625_v26, %v1629_v21  ;;  %v4399_v26 = vld [vmem:[%s7295_s9 + $0x178] sm:$0xff]  ;;  %s4217_s19 = sshll.u32 %s594_s22, 4  ;;  %s7245_s19 = int_to_ptr.vmem [resolvable:$true] %s4217_s19 }
 0x12d   : > { %4326 = vmatmul.mubr.msk.f32.gmra.mrb[16].mxu0 %vm607_vm4, %v6033_v33  ;;  %v1763_v33 = vld [vmem:[%s7291_s5] sm:$0xff]  ;;  %s5545_s27 = scalar_lea.vmem %s7245_s19, 16  ;;  %p5552_p0 = scmp.lt.s32.totalorder %s7245_s19, %s5550_s0 }
 0x12e   : > { %1394 = vmatprep.mubr.f32.mxu0 %v5611_v1  ;;  %v5118_v36 = vpack.c.bf16 %v1764_v35, %v1763_v33  ;;  %p5546_p11 = scmp.ne.s32.totalorder %s7245_s19, %s5545_s27  ;;  %p5553_p1 = scmp.lt.s32.totalorder %s5551_s2, %s5545_s27 }
 0x130   : > { %p5547_p12 = pnand %p5546_p11, %p5752_p5  ;;  %p5554_p2 = por %p5553_p1, %p5552_p0 }
 0x131   : > { %4344 = vmatmul.mubr.msk.f32.vlgmr.msra.gmra.mrb[12].mxu0 %vm607_vm4, %v6047_v43  ;;  %v1769_v43 = vld [vmem:[%s7291_s5 + $0x30] sm:$0xff] }
 0x132   : > { %1400 = vmatprep.mubr.f32.mxu0 %v5611_v1  ;;  %5065 = vmatpush1.bf16.msra.mxu0 %v5064_v29  ;;  %v5127_v45 = vpack.c.bf16 %v1770_v44, %v1769_v43  ;;  %p5548_p13 = pneg %p5547_p12 }
 0x133   : > { %5068 = vmatprep.subr.msk.bf16.mxu0 %vm5774_vm3, %v5066_v30 }
 0x134   : > { %p5555_p3 = pnand %p5554_p2, %p5548_p13 }
 0x135   : > { %4345 = vmatmul.mubr.msk.f32.gmra.mrb[14].mxu0 %vm607_vm4, %v6053_v49  ;;  %v1773_v49 = vld [vmem:[%s7291_s5 + $0x50] sm:$0xff] }
 0x136   : > { %1406 = vmatprep.mubr.f32.mxu0 %v5611_v1  ;;  %5071 = vmatpush1.bf16.msk.msra.mxu0 %vm5774_vm3, %v5069_v34  ;;  %v5133_v51 = vpack.c.bf16 %v1774_v50, %v1773_v49 }
 0x137   : > { %5117 = vmatprep.subr.bf16.mxu0 %v5609_v0 }
 0x139   : > { %4346 = vmatmul.mubr.msk.f32.gmra.mrb[16].mxu0 %vm607_vm4, %v6071_v57  ;;  %v5139_v57 = vpack.c.bf16 %v1778_v56, %v1777_v55 }
 0x13a   : > { %1600 = vmatprep.mubr.f32.mxu0 %v5611_v1 }
 0x13d   : > { %4364 = vmatmul.mubr.msk.f32.vlgmr.msra.gmra.mrb[12].mxu0 %vm607_vm4, %v6087_v4  ;;  %v5148_v4 = vpack.c.bf16 %v1784_v3, %v1783_v2  ;;  %v4384_v2 = vld [vmem:[%s7295_s9 + $0x100] sm:$0xff]  ;;  %v4387_v3 = vld [vmem:[%s7295_s9 + $0x118] sm:$0xff] }
 0x13e   : > { %1606 = vmatprep.mubr.f32.mxu0 %v5611_v1  ;;  %5119 = vmatpush1.bf16.msra.mxu0 %v5118_v36  ;;  %v5180_v5 = vpack.c.bf16 %v4384_v2, %v4382_v62  ;;  %v2970_v62 = vld [vmem:[%s7297_s11] sm:$0xff]  ;;  %v2972_v2 = vld [vmem:[%s7297_s11 + $0x10] sm:$0xff] }
 0x13f   : > { %5120 = vmatprep.subr.bf16.mxu0 %v5609_v0 }
 0x141   : > { %4365 = vmatmul.mubr.msk.f32.gmra.mrb[14].mxu0 %vm607_vm4, %v6093_v9  ;;  %v1787_v9 = vld [vmem:[%s7291_s5 + $0xc0] sm:$0xff] }
 0x142   : > { %1612 = vmatprep.mubr.f32.mxu0 %v5611_v1  ;;  %5122 = vmatpush1.bf16.msra.mxu0 %v5121_v39  ;;  %v5154_v11 = vpack.c.bf16 %v1788_v10, %v1787_v9  ;;  %v4388_v9 = vld [vmem:[%s7295_s9 + $0x120] sm:$0xff]  ;;  %v4391_v10 = vld [vmem:[%s7295_s9 + $0x138] sm:$0xff] }
 0x143   : > { %5123 = vmatprep.subr.bf16.mxu0 %v5609_v0 }
 0x145   : > { %4366 = vmatmul.mubr.msk.f32.gmra.mrb[16].mxu0 %vm607_vm4, %v1508_v15  ;;  %v1671_v15 = vld [vmem:[%s7290_s4 + $0xe0] sm:$0xff] }
 0x146   : > { %5125 = vmatpush1.bf16.msra.mxu0 %v5124_v42  ;;  %v5115_v18 = vpack.c.bf16 %v1672_v16, %v1671_v15  ;;  %v4392_v15 = vld [vmem:[%s7295_s9 + $0x140] sm:$0xff]  ;;  %v4395_v16 = vld [vmem:[%s7295_s9 + $0x158] sm:$0xff] }
 0x147   : > { %5126 = vmatprep.subr.bf16.mxu0 %v5609_v0  ;;  %v5190_v19 = vpack.c.bf16 %v4397_v17, %v4395_v16  ;;  %v2129_v17 = vld [vmem:[%s7295_s9 + $0x20] sm:$0xff] }
 0x148   : > { %5116 = vmatpush1.bf16.msra.mxu1 %v5115_v18 }
 0x14a   : > { %5128 = vmatpush1.bf16.msra.mxu0 %v5127_v45 }
 0x14b   : > { %5129 = vmatprep.subr.bf16.mxu0 %v5609_v0 }
 0x14e   : > { %5131 = vmatpush1.bf16.msra.mxu0 %v5130_v48 }
 0x14f   : > { %5132 = vmatprep.subr.bf16.mxu0 %v5609_v0 }
 0x152   : > { %5134 = vmatpush1.bf16.msra.mxu0 %v5133_v51 }
 0x153   : > { %5135 = vmatprep.subr.bf16.mxu0 %v5609_v0 }
 0x156   : > { %5137 = vmatpush1.bf16.msra.mxu0 %v5136_v54 }
 0x157   : > { %5138 = vmatprep.subr.bf16.mxu0 %v5609_v0 }
 0x15a   : > { %5140 = vmatpush1.bf16.msra.mxu0 %v5139_v57  ;;  %v1877_v57 = vld [vmem:[%s7292_s6 + $0x8] sm:$0xf] }
 0x15b   : > { %5141 = vmatprep.subr.bf16.mxu0 %v5609_v0 }
 0x15e   : > { %5143 = vmatpush1.bf16.msra.mxu0 %v5142_v60  ;;  %v4383_v60 = vld [vmem:[%s7295_s9 + $0xf8] sm:$0xff] }
 0x15f   : > { %5144 = vmatprep.subr.bf16.mxu0 %v5609_v0 }
 0x162   : > { %5146 = vmatpush1.bf16.msra.mxu0 %v5145_v63  ;;  %v5178_v63 = vpack.c.bf16 %v4385_v61, %v4383_v60  ;;  %v2128_v60 = vld [vmem:[%s7295_s9 + $0x18] sm:$0xff] }
 0x163   : > { %5147 = vmatprep.subr.bf16.mxu0 %v5609_v0 }
 0x166   : > { %5149 = vmatpush1.bf16.msra.mxu0 %v5148_v4  ;;  %v4389_v4 = vld [vmem:[%s7295_s9 + $0x128] sm:$0xff] }
 0x167   : > { %5150 = vmatprep.subr.bf16.mxu0 %v5609_v0  ;;  %v5182_v6 = vpack.c.bf16 %v4389_v4, %v4387_v3  ;;  %v2973_v4 = vld [vmem:[%s7297_s11 + $0x18] sm:$0xff] }
 0x16a   : > { %5152 = vmatpush1.bf16.msra.mxu0 %v5151_v7  ;;  %v4386_v7 = vld [vmem:[%s7295_s9 + $0x110] sm:$0xff] }
 0x16b   : > { %5153 = vmatprep.subr.bf16.mxu0 %v5609_v0  ;;  %v5184_v12 = vpack.c.bf16 %v4388_v9, %v4386_v7  ;;  %v2130_v9 = vld [vmem:[%s7295_s9 + $0x28] sm:$0xff] }
 0x16e   : > { %5155 = vmatpush1.bf16.msra.mxu0 %v5154_v11  ;;  %v4393_v11 = vld [vmem:[%s7295_s9 + $0x148] sm:$0xff] }
 0x16f   : > { %5156 = vmatprep.subr.bf16.mxu0 %v5609_v0  ;;  %v5186_v13 = vpack.c.bf16 %v4393_v11, %v4391_v10  ;;  %v2132_v10 = vld [vmem:[%s7295_s9 + $0x38] sm:$0xff]  ;;  %v5334_v11 = vpack.c.bf16 %v2973_v4, %v2972_v2  ;;  %v2147_v2 = vld [vmem:[%s7295_s9 + $0xb0] sm:$0xff] }
 0x170   : > { %v5210_v16 = vpack.c.bf16 %v2132_v10, %v2130_v9  ;;  %v2152_v4 = vld [vmem:[%s7295_s9 + $0xd8] sm:$0xff] }
 0x171   : > { %v2985_v9 = vld [vmem:[%s7297_s11 + $0x78] sm:$0xff] }
 0x172   : > { %5158 = vmatpush1.bf16.msra.mxu0 %v5157_v14  ;;  %v4390_v14 = vld [vmem:[%s7295_s9 + $0x130] sm:$0xff] }
 0x173   : > { %5159 = vmatprep.subr.bf16.mxu0 %v5609_v0  ;;  %v5188_v18 = vpack.c.bf16 %v4392_v15, %v4390_v14  ;;  %v2975_v14 = vld [vmem:[%s7297_s11 + $0x28] sm:$0xff] }
 0x176   : > { %5161 = vmatpush1.bf16.msra.mxu0 %v5160_v20  ;;  %v4394_v20 = vld [vmem:[%s7295_s9 + $0x150] sm:$0xff] }
 0x177   : > { %5179 = vmatprep.subr.bf16.mxu0 %v5178_v63  ;;  %v2971_v63 = vld [vmem:[%s7297_s11 + $0x8] sm:$0xff] }
 0x178   : > { %v5331_v3 = vpack.c.bf16 %v2971_v63, %v2970_v62  ;;  %v2145_v63 = vld [vmem:[%s7295_s9 + $0xa0] sm:$0xff] }
 0x179   : > { %v5228_v10 = vpack.c.bf16 %v2147_v2, %v2145_v63  ;;  %v4441_v2 = vld [vmem:[%s7295_s9 + $0x2a0] sm:$0xff] }
 0x210   : > { %v1602_v25 = vpop.f32.mrb[12].mxu0 }
 0x211   : > { %v1604_v29 = vpop.f32.mrb[13].mxu0  ;;  %v1637_v31 = vadd.f32 %v1630_v28, %v1602_v25 }
 0x212   : > { %v1638_v30 = vadd.f32 %v1634_v27, %v1604_v29  ;;  %v4398_v29 = vld [vmem:[%s7295_s9 + $0x170] sm:$0xff] }
 0x214   : > { %v1608_v32 = vpop.f32.mrb[14].mxu0  ;;  %4367 = vmatprep.mubr.msk.f32.mxu1 %vm1673_vm5, %v1638_v30  ;;  %4370 = vmatprep.mubr.msk.f32.mxu0 %vm1673_vm5, %v1638_v30  ;;  %v4400_v30 = vld [vmem:[%s7295_s9 + $0x180] sm:$0xff] }
 0x215   : > { %v1610_v34 = vpop.f32.mrb[15].mxu0  ;;  %1748 = vmatmul.mubr.f32.vlgmr.msra.gmra.mrb[18].mxu1 %v1637_v31  ;;  %1858 = vmatmul.mubr.f32.vlgmr.msra.gmra.mrb[18].mxu0 %v1637_v31  ;;  %v1639_v35 = vadd.f32 %v1630_v28, %v1608_v32  ;;  %v4403_v31 = vld [vmem:[%s7295_s9 + $0x198] sm:$0xff]  ;;  %v4405_v32 = vld [vmem:[%s7295_s9 + $0x1a8] sm:$0xff] }
 0x216   : > { %v1640_v33 = vadd.f32 %v1634_v27, %v1610_v34  ;;  %5181 = vmatpush1.bf16.msra.mxu0 %v5180_v5  ;;  %v5196_v34 = vpack.c.bf16 %v4400_v30, %v4398_v29  ;;  %v2125_v5 = vld [vmem:[%s7295_s9] sm:$0xff] }
 0x217   : > { %5183 = vmatprep.subr.bf16.mxu0 %v5182_v6  ;;  %v2127_v6 = vld [vmem:[%s7295_s9 + $0x10] sm:$0xff] }
 0x218   : > { %v1614_v36 = vpop.f32.mrb[16].mxu0  ;;  %4368 = vmatprep.mubr.msk.f32.mxu1 %vm1673_vm5, %v1640_v33  ;;  %4371 = vmatprep.mubr.msk.f32.mxu0 %vm1673_vm5, %v1640_v33  ;;  %v5198_v33 = vpack.c.bf16 %v4405_v32, %v4403_v31  ;;  %v5208_v15 = vpack.c.bf16 %v2127_v6, %v2125_v5  ;;  %v2133_v31 = vld [vmem:[%s7295_s9 + $0x40] sm:$0xff]  ;;  %v2135_v32 = vld [vmem:[%s7295_s9 + $0x50] sm:$0xff] }
 0x219   : > { %v1616_v37 = vpop.f32.mrb[17].mxu0  ;;  %1753 = vmatmul.mubr.f32.gmra.mrb[20].mxu1 %v1639_v35  ;;  %1863 = vmatmul.mubr.f32.gmra.mrb[20].mxu0 %v1639_v35  ;;  %v1641_v39 = vadd.f32 %v1630_v28, %v1614_v36  ;;  %v5192_v28 = vpack.c.bf16 %v4396_v22, %v4394_v20  ;;  %v4402_v35 = vld [vmem:[%s7295_s9 + $0x190] sm:$0xff]  ;;  %v4404_v36 = vld [vmem:[%s7295_s9 + $0x1a0] sm:$0xff]  ;;  %v2134_v20 = vld [vmem:[%s7295_s9 + $0x48] sm:$0xff] }
 0x21a   : > { %v1642_v38 = vadd.f32 %v1634_v27, %v1616_v37  ;;  %5185 = vmatpush1.bf16.msra.mxu0 %v5184_v12  ;;  %v4401_v27 = vld [vmem:[%s7295_s9 + $0x188] sm:$0xff]  ;;  %v4407_v37 = vld [vmem:[%s7295_s9 + $0x1b8] sm:$0xff]  ;;  %v2984_v6 = vld [vmem:[%s7297_s11 + $0x70] sm:$0xff] }
 0x21b   : > { %5187 = vmatprep.subr.bf16.mxu0 %v5186_v13  ;;  %v5194_v25 = vpack.c.bf16 %v4401_v27, %v4399_v26  ;;  %v2974_v13 = vld [vmem:[%s7297_s11 + $0x20] sm:$0xff]  ;;  %v2136_v22 = vld [vmem:[%s7295_s9 + $0x58] sm:$0xff] }
 0x21c   : > { %4369 = vmatprep.mubr.msk.f32.mxu1 %vm1673_vm5, %v1642_v38  ;;  %4372 = vmatprep.mubr.msk.f32.mxu0 %vm1673_vm5, %v1642_v38  ;;  %v4409_v38 = vld [vmem:[%s7295_s9 + $0x1c8] sm:$0xff]  ;;  %v5337_v26 = vpack.c.bf16 %v2975_v14, %v2974_v13  ;;  %v5214_v30 = vpack.c.bf16 %v2136_v22, %v2134_v20  ;;  %v2151_v13 = vld [vmem:[%s7295_s9 + $0xd0] sm:$0xff]  ;;  %v5352_v14 = vpack.c.bf16 %v2985_v9, %v2984_v6  ;;  %v4420_v20 = vld [vmem:[%s7295_s9 + $0x1f8] sm:$0xff] }
 0x21d   : > { %1758 = vmatmul.mubr.f32.gmra.mrb[22].mxu1 %v1641_v39  ;;  %1868 = vmatmul.mubr.f32.gmra.mrb[22].mxu0 %v1641_v39  ;;  %v5200_v39 = vpack.c.bf16 %v4404_v36, %v4402_v35  ;;  %v4452_v6 = vld [vmem:[%s7295_s9 + $0x2d8] sm:$0xff]  ;;  %v4454_v9 = vld [vmem:[%s7295_s9 + $0x2e8] sm:$0xff] }
 0x21e   : > { %2329 = vmatprep.mubr.f32.mxu0 %v5611_v1  ;;  %4791 = vmatprep.mubr.msk.f32.mxu1 %vm1878_vm6, %v1876_v40  ;;  %v5202_v40 = vpack.c.bf16 %v4409_v38, %v4407_v37  ;;  %v2978_v38 = vld [vmem:[%s7297_s11 + $0x40] sm:$0xff] }
 0x21f   : > { %5189 = vmatpush1.bf16.msra.mxu0 %v5188_v18  ;;  %v2131_v18 = vld [vmem:[%s7295_s9 + $0x30] sm:$0xff] }
 0x220   : > { %5191 = vmatprep.subr.bf16.mxu0 %v5190_v19  ;;  %v5212_v29 = vpack.c.bf16 %v2131_v18, %v2129_v17  ;;  %v2154_v18 = vld [vmem:[%s7295_s9 + $0xe8] sm:$0xff] }
 0x223   : > { %5193 = vmatpush1.bf16.msra.mxu0 %v5192_v28  ;;  %v2976_v28 = vld [vmem:[%s7297_s11 + $0x30] sm:$0xff] }
 0x224   : > { %5195 = vmatprep.subr.bf16.mxu0 %v5194_v25  ;;  %v2977_v25 = vld [vmem:[%s7297_s11 + $0x38] sm:$0xff] }
 0x225   : > { %v5340_v36 = vpack.c.bf16 %v2977_v25, %v2976_v28  ;;  %v4422_v28 = vld [vmem:[%s7295_s9 + $0x208] sm:$0xff]  ;;  %v4424_v25 = vld [vmem:[%s7295_s9 + $0x218] sm:$0xff] }
 0x227   : > { %5197 = vmatpush1.bf16.msra.mxu0 %v5196_v34  ;;  %v2138_v34 = vld [vmem:[%s7295_s9 + $0x68] sm:$0xff] }
 0x228   : > { %5199 = vmatprep.subr.bf16.mxu0 %v5198_v33  ;;  %v2140_v33 = vld [vmem:[%s7295_s9 + $0x78] sm:$0xff] }
 0x22b   : > { %5201 = vmatpush1.bf16.msra.mxu0 %v5200_v39  ;;  %v2979_v39 = vld [vmem:[%s7297_s11 + $0x48] sm:$0xff] }
 0x22c   : > { %5203 = vmatprep.subr.bf16.mxu0 %v5202_v40  ;;  %v5216_v40 = vpack.c.bf16 %v2135_v32, %v2133_v31  ;;  %v5242_v32 = vpack.c.bf16 %v4424_v25, %v4422_v28  ;;  %v4459_v28 = vld [vmem:[%s7295_s9 + $0x310] sm:$0xff]  ;;  %v4461_v25 = vld [vmem:[%s7295_s9 + $0x320] sm:$0xff] }
 0x2e8   : > { %v1749_v41 = vpop.f32.mrb[18].mxu1  ;;  %v1859_v42 = vpop.f32.mrb[18].mxu0 }
 0x2e9   : > { %v1873_v43 = vmax.f32 %v1749_v41, %v1859_v42  ;;  %v1751_v44 = vpop.f32.mrb[19].mxu1  ;;  %v1861_v45 = vpop.f32.mrb[19].mxu0  ;;  %v4406_v41 = vld [vmem:[%s7295_s9 + $0x1b0] sm:$0xff]  ;;  %v4408_v42 = vld [vmem:[%s7295_s9 + $0x1c0] sm:$0xff] }
 0x2ec   : > { %v1754_v46 = vpop.f32.mrb[20].mxu1  ;;  %v1864_v47 = vpop.f32.mrb[20].mxu0 }
 0x2ed   : > { %v1874_v48 = vmax.f32 %v1754_v46, %v1864_v47  ;;  %v1756_v49 = vpop.f32.mrb[21].mxu1  ;;  %v1866_v50 = vpop.f32.mrb[21].mxu0 }
 0x2ef   : > { %v5162_v51 = vpack.c.bf16 %v1874_v48, %v1873_v43  ;;  %v5204_v43 = vpack.c.bf16 %v4408_v42, %v4406_v41  ;;  %v5218_v41 = vpack.c.bf16 %v2140_v33, %v2138_v34  ;;  %v2137_v42 = vld [vmem:[%s7295_s9 + $0x60] sm:$0xff]  ;;  %v4423_v33 = vld [vmem:[%s7295_s9 + $0x210] sm:$0xff] }
 0x2f0   : > { %v1759_v52 = vpop.f32.mrb[22].mxu1  ;;  %v1869_v53 = vpop.f32.mrb[22].mxu0  ;;  %v4421_v34 = vld [vmem:[%s7295_s9 + $0x200] sm:$0xff] }
 0x2f1   : > { %v1875_v54 = vmax.f32 %v1759_v52, %v1869_v53  ;;  %v1761_v55 = vpop.f32.mrb[23].mxu1  ;;  %v1871_v56 = vpop.f32.mrb[23].mxu0  ;;  %5163 = vmatprep.subr.bf16.mxu1 %v5162_v51  ;;  %5205 = vmatpush1.bf16.msra.mxu0 %v5204_v43  ;;  %v2047_v53 = vld [vmem:[%s7294_s8] sm:$0xff]  ;;  %v2139_v43 = vld [vmem:[%s7295_s9 + $0x70] sm:$0xff] }
 0x2f2   : > { %5165 = vmatpush3.bf16.msra.mxu1 %v5162_v51  ;;  %v4414_v55 = vld [vmem:[%s7294_s8 + $0x10] sm:$0xff]  ;;  %v4448_v56 = vld [vmem:[%s7294_s8 + $0x18] sm:$0xff] }
 0x2f3   : > { %4789 = vmatprep.subr.mxu1 %v1875_v54 }
 0x2f6   : > { %4790 = vmatpush3.msra.mxu1 %v1875_v54 }
 0x2f7   : > { %5167 = vmatprep.subr.bf16.mxu1 %v5162_v51  ;;  %4792 = vmatmul.mubr.msk.f32.vlgmr.msra.gmra.mrb[24].mxu1 %vm1878_vm6, %v1877_v57  ;;  %v4482_v57 = vld [vmem:[%s7294_s8 + $0x20] sm:$0xff] }
 0x2f8   : > { %5169 = vmatpush3.bf16.msra.mxu1 %v5162_v51  ;;  %4800 = vmatprep.mubr.msk.f32.mxu1 %vm1878_vm6, %v1960_v58  ;;  %v4411_v58 = vld [vmem:[%s7295_s9 + $0x1d8] sm:$0xff] }
 0x2f9   : > { %4798 = vmatprep.subr.mxu1 %v1875_v54  ;;  %2293 = vmatprep.subr.mxu0 %v4411_v58 }
 0x2fa   : > { %2294 = vmatpush1.msra.mxu0 %v4410_v8 }
 0x2fc   : > { %4799 = vmatpush3.msra.mxu1 %v1875_v54  ;;  %v4379_v54 = vld [vmem:[%s7294_s8 + $0x8] sm:$0xff] }
 0x2fd   : > { %4801 = vmatmul.mubr.msk.f32.vlgmr.msra.gmra.mrb[26].mxu1 %vm1878_vm6, %v1961_v59  ;;  %5170 = vmatprep.subr.bf16.mxu1 %v5609_v0  ;;  %v2126_v59 = vld [vmem:[%s7295_s9 + $0x8] sm:$0xff] }
 0x2fe   : > { %4807 = vmatprep.mubr.msk.f32.mxu1 %vm5610_vm0, %v5611_v1  ;;  %v5206_v61 = vpack.c.bf16 %v2128_v60, %v2126_v59  ;;  %v2982_v59 = vld [vmem:[%s7297_s11 + $0x60] sm:$0xff]  ;;  %v2983_v60 = vld [vmem:[%s7297_s11 + $0x68] sm:$0xff] }
 0x2ff   : > { %v5349_v5 = vpack.c.bf16 %v2983_v60, %v2982_v59  ;;  %v4439_v59 = vld [vmem:[%s7295_s9 + $0x290] sm:$0xff]  ;;  %v4442_v60 = vld [vmem:[%s7295_s9 + $0x2a8] sm:$0xff] }
 0x300   : > { %5207 = vmatprep.subr.bf16.mxu0 %v5206_v61 }
 0x3ca   : > { %v4793_v44 = vpop.f32.mrb[24].mxu1 }
 0x3cb   : > { %v1951_v45 = vpop.f32.mrb[25].mxu1 }
 0x3d0   : > { %v4802_v46 = vpop.f32.mrb[26].mxu1 }
 0x3d1   : > { %v2044_v47 = vmax.f32 %v4793_v44, %v4802_v46  ;;  %v2034_v48 = vpop.f32.mrb[27].mxu1  ;;  %v2142_v44 = vld [vmem:[%s7295_s9 + $0x88] sm:$0xff] }
 0x3d2   : > { %v2043_v49 = vmax.f32 %v1951_v45, %v2034_v48  ;;  %v2144_v45 = vld [vmem:[%s7295_s9 + $0x98] sm:$0xff] }
 0x3d3   : > { %v2046_v50 = vmax.f32 %v2044_v47, 0.0  ;;  %v5343_v47 = vpack.c.bf16 %v2979_v39, %v2978_v38  ;;  %v5244_v38 = vpack.c.bf16 %v4423_v33, %v4421_v34  ;;  %v4465_v34 = vld [vmem:[%s7295_s9 + $0x340] sm:$0xff]  ;;  %v4468_v33 = vld [vmem:[%s7295_s9 + $0x358] sm:$0xff] }
 0x3d4   : > { %v2045_v51 = vmax.f32 %v2043_v49, 0.0  ;;  %v2980_v49 = vld [vmem:[%s7297_s11 + $0x50] sm:$0xff] }
 0x3d6   : > { %v5171_v52 = vpack.c.bf16 %v2046_v50, %v2045_v51  ;;  %v2981_v50 = vld [vmem:[%s7297_s11 + $0x58] sm:$0xff]  ;;  %v5220_v51 = vpack.c.bf16 %v2139_v43, %v2137_v42  ;;  %v4430_v42 = vld [vmem:[%s7295_s9 + $0x248] sm:$0xff] }
 0x3d7   : > { %v5346_v58 = vpack.c.bf16 %v2981_v50, %v2980_v49  ;;  %v4436_v49 = vld [vmem:[%s7295_s9 + $0x278] sm:$0xff] }
 0x3d8   : > { %5173 = vmatpush3.bf16.msk.msra.mxu1 %vm5774_vm3, %v5171_v52 }
 0x3d9   : > { %5174 = vmatprep.subr.bf16.mxu1 %v5609_v0 }
 0x3db   : > { %4808 = vmatmul.mubr.msk.f32.vlgmr.msra.gmra.mrb[28].mxu1 %vm2048_vm7, %v2047_v53  ;;  %v2141_v53 = vld [vmem:[%s7295_s9 + $0x80] sm:$0xff] }
 0x3dc   : > { %5177 = vmatpush3.bf16.msk.msra.mxu1 %vm5774_vm3, %v5171_v52  ;;  %4814 = vmatprep.mubr.msk.f32.mxu1 %vm5610_vm0, %v5611_v1 }
 0x3dd   : > { %5234 = vmatprep.subr.bf16.mxu1 %v5609_v0 }
 0x3df   : > { %4815 = vmatmul.mubr.msk.f32.vlgmr.msra.gmra.mrb[30].mxu1 %vm2048_vm7, %v4379_v54  ;;  %v2143_v54 = vld [vmem:[%s7295_s9 + $0x90] sm:$0xff] }
 0x3e0   : > { %5237 = vmatpush3.bf16.msk.msra.mxu1 %vm5774_vm3, %v5171_v52  ;;  %4821 = vmatprep.mubr.msk.f32.mxu1 %vm5610_vm0, %v5611_v1  ;;  %v5224_v61 = vpack.c.bf16 %v2143_v54, %v2141_v53  ;;  %v4435_v53 = vld [vmem:[%s7295_s9 + $0x270] sm:$0xff]  ;;  %v4438_v54 = vld [vmem:[%s7295_s9 + $0x288] sm:$0xff] }
 0x3e1   : > { %5266 = vmatprep.subr.bf16.mxu1 %v5609_v0 }
 0x3e3   : > { %4822 = vmatmul.mubr.msk.f32.vlgmr.msra.gmra.mrb[32].mxu1 %vm2048_vm7, %v4414_v55  ;;  %v2146_v55 = vld [vmem:[%s7295_s9 + $0xa8] sm:$0xff] }
 0x3e4   : > { %5269 = vmatpush3.bf16.msk.msra.mxu1 %vm5774_vm3, %v5171_v52  ;;  %4828 = vmatprep.mubr.msk.f32.mxu1 %vm5610_vm0, %v5611_v1 }
 0x3e5   : > { %5298 = vmatprep.subr.bf16.mxu1 %v5609_v0 }
 0x3e7   : > { %4829 = vmatmul.mubr.msk.f32.vlgmr.msra.gmra.mrb[34].mxu1 %vm2048_vm7, %v4448_v56  ;;  %v2148_v56 = vld [vmem:[%s7295_s9 + $0xb8] sm:$0xff] }
 0x3e8   : > { %5301 = vmatpush3.bf16.msk.msra.mxu1 %vm5774_vm3, %v5171_v52  ;;  %4835 = vmatprep.mubr.msk.f32.mxu1 %vm5610_vm0, %v5611_v1  ;;  %v5222_v52 = vpack.c.bf16 %v2144_v45, %v2142_v44  ;;  %v5226_v62 = vpack.c.bf16 %v2148_v56, %v2146_v55  ;;  %v4429_v45 = vld [vmem:[%s7295_s9 + $0x240] sm:$0xff]  ;;  %v4440_v55 = vld [vmem:[%s7295_s9 + $0x298] sm:$0xff] }
 0x3e9   : > { %5330 = vmatprep.subr.bf16.mxu1 %v5609_v0 }
 0x3eb   : > { %4836 = vmatmul.mubr.msk.f32.vlgmr.msra.gmra.mrb[36].mxu1 %vm2048_vm7, %v4482_v57 }
 0x3ec   : > { %5332 = vmatpush1.bf16.msra.mxu1 %v5331_v3  ;;  %v2150_v3 = vld [vmem:[%s7295_s9 + $0xc8] sm:$0xff] }
 0x3ed   : > { %5333 = vmatprep.subr.bf16.mxu1 %v5609_v0 }
 0x3f0   : > { %5335 = vmatpush1.bf16.msra.mxu1 %v5334_v11  ;;  %v5230_v11 = vpack.c.bf16 %v2152_v4, %v2150_v3  ;;  %v4443_v3 = vld [vmem:[%s7295_s9 + $0x2b0] sm:$0xff] }
 0x3f1   : > { %5336 = vmatprep.subr.bf16.mxu1 %v5609_v0  ;;  %v5264_v4 = vpack.c.bf16 %v4443_v3, %v4441_v2  ;;  %v4489_v3 = vld [vmem:[%s7295_s9 + $0x3e0] sm:$0xff] }
 0x3f4   : > { %5338 = vmatpush1.bf16.msra.mxu1 %v5337_v26  ;;  %v4417_v26 = vld [vmem:[%s7295_s9 + $0x1e0] sm:$0xff] }
 0x3f5   : > { %5339 = vmatprep.subr.bf16.mxu1 %v5609_v0 }
 0x3f8   : > { %5341 = vmatpush1.bf16.msra.mxu1 %v5340_v36  ;;  %v4426_v36 = vld [vmem:[%s7295_s9 + $0x228] sm:$0xff] }
 0x3f9   : > { %5342 = vmatprep.subr.bf16.mxu1 %v5609_v0 }
 0x3fc   : > { %5344 = vmatpush1.bf16.msra.mxu1 %v5343_v47  ;;  %v4431_v47 = vld [vmem:[%s7295_s9 + $0x250] sm:$0xff] }
 0x3fd   : > { %5345 = vmatprep.subr.bf16.mxu1 %v5609_v0  ;;  %v5252_v50 = vpack.c.bf16 %v4431_v47, %v4429_v45  ;;  %v4473_v45 = vld [vmem:[%s7295_s9 + $0x380] sm:$0xff]  ;;  %v4476_v47 = vld [vmem:[%s7295_s9 + $0x398] sm:$0xff] }
 0x400   : > { %5347 = vmatpush1.bf16.msra.mxu1 %v5346_v58  ;;  %v5258_v58 = vpack.c.bf16 %v4440_v55, %v4438_v54  ;;  %v4480_v54 = vld [vmem:[%s7295_s9 + $0x3b8] sm:$0xff]  ;;  %v4486_v55 = vld [vmem:[%s7295_s9 + $0x3c8] sm:$0xff] }
 0x401   : > { %5348 = vmatprep.subr.bf16.mxu1 %v5609_v0 }
 0x404   : > { %5350 = vmatpush1.bf16.msra.mxu1 %v5349_v5  ;;  %v4446_v5 = vld [vmem:[%s7295_s9 + $0x2c8] sm:$0xff] }
 0x405   : > { %5351 = vmatprep.subr.bf16.mxu1 %v5609_v0 }
 0x408   : > { %5353 = vmatpush1.bf16.msra.mxu1 %v5352_v14  ;;  %v4445_v14 = vld [vmem:[%s7295_s9 + $0x2c0] sm:$0xff] }
 0x409   : > { %5354 = vmatprep.subr.bf16.mxu1 %v5609_v0 }
 0x4ae   : > { %v6482_v7 = vpop.f32.mrb[28].mxu1 }
 0x4af   : > { %v4809_v12 = vpop.f32.mrb[29].mxu1 }
 0x4b0   : > { %v2149_v12 = vld [vmem:[%s7295_s9 + $0xc0] sm:$0xff] }
 0x4b1   : > { %v5232_v17 = vpack.c.bf16 %v2151_v13, %v2149_v12  ;;  %v4456_v12 = vld [vmem:[%s7295_s9 + $0x2f8] sm:$0xff]  ;;  %v4458_v13 = vld [vmem:[%s7295_s9 + $0x308] sm:$0xff] }
 0x4b2   : > { %v2226_v19 = vpop.f32.mrb[30].mxu1 }
 0x4b3   : > { %4412 = vmatmul.mubr.msk.f32.vlgmr.msra.gmra.mrb[24].mxu0 %vm2261_vm8, %v2226_v19  ;;  %v4816_v27 = vpop.f32.mrb[31].mxu1  ;;  %v4418_v19 = vld [vmem:[%s7295_s9 + $0x1e8] sm:$0xff] }
 0x4b4   : > { %5209 = vmatpush1.bf16.msra.mxu0 %v5208_v15  ;;  %2403 = vmatprep.mubr.f32.mxu0 %v5611_v1  ;;  %v2986_v15 = vld [vmem:[%s7297_s11 + $0x80] sm:$0xff]  ;;  %v4419_v27 = vld [vmem:[%s7295_s9 + $0x1f0] sm:$0xff] }
 0x4b5   : > { %5211 = vmatprep.subr.bf16.mxu0 %v5210_v16  ;;  %v2987_v16 = vld [vmem:[%s7297_s11 + $0x88] sm:$0xff]  ;;  %v5240_v31 = vpack.c.bf16 %v4419_v27, %v4417_v26 }
 0x4b6   : > { %v6530_v35 = vpop.f32.mrb[32].mxu1  ;;  %v5355_v22 = vpack.c.bf16 %v2987_v16, %v2986_v15  ;;  %v5270_v15 = vpack.c.bf16 %v4454_v9, %v4452_v6  ;;  %v4496_v6 = vld [vmem:[%s7295_s9 + $0x418] sm:$0xff] }
 0x4b7   : > { %v4823_v37 = vpop.f32.mrb[33].mxu1 }
 0x4b8   : > { %5213 = vmatpush1.bf16.msra.mxu0 %v5212_v29  ;;  %v2153_v29 = vld [vmem:[%s7295_s9 + $0xe0] sm:$0xff]  ;;  %5356 = vmatpush1.bf16.msra.mxu1 %v5355_v22  ;;  %v4428_v37 = vld [vmem:[%s7295_s9 + $0x238] sm:$0xff]  ;;  %v4462_v22 = vld [vmem:[%s7295_s9 + $0x328] sm:$0xff] }
 0x4b9   : > { %5215 = vmatprep.subr.bf16.mxu0 %v5214_v30  ;;  %v5238_v30 = vpack.c.bf16 %v4420_v20, %v4418_v19  ;;  %5357 = vmatprep.subr.bf16.mxu1 %v5609_v0  ;;  %v5246_v39 = vpack.c.bf16 %v4428_v37, %v4426_v36  ;;  %v4457_v19 = vld [vmem:[%s7295_s9 + $0x300] sm:$0xff]  ;;  %v4460_v20 = vld [vmem:[%s7295_s9 + $0x318] sm:$0xff]  ;;  %v4470_v36 = vld [vmem:[%s7295_s9 + $0x368] sm:$0xff] }
 0x4ba   : > { %v6551_v46 = vpop.f32.mrb[34].mxu1  ;;  %v5278_v27 = vpack.c.bf16 %v4462_v22, %v4460_v20 }
 0x4bb   : > { %v4830_v48 = vpop.f32.mrb[35].mxu1 }
 0x4bc   : > { %5217 = vmatpush1.bf16.msra.mxu0 %v5216_v40  ;;  %v4425_v40 = vld [vmem:[%s7295_s9 + $0x220] sm:$0xff]  ;;  %v4434_v48 = vld [vmem:[%s7295_s9 + $0x268] sm:$0xff] }
 0x4bd   : > { %5219 = vmatprep.subr.bf16.mxu0 %v5218_v41  ;;  %v4427_v41 = vld [vmem:[%s7295_s9 + $0x230] sm:$0xff] }
 0x4be   : > { %v6572_v57 = vpop.f32.mrb[36].mxu1  ;;  %v5248_v43 = vpack.c.bf16 %v4427_v41, %v4425_v40  ;;  %v4469_v40 = vld [vmem:[%s7295_s9 + $0x360] sm:$0xff]  ;;  %v4472_v41 = vld [vmem:[%s7295_s9 + $0x378] sm:$0xff] }
 0x4bf   : > { %v4837_v8 = vpop.f32.mrb[37].mxu1 }
 0x4c0   : > { %5221 = vmatpush1.bf16.msra.mxu0 %v5220_v51  ;;  %v5254_v51 = vpack.c.bf16 %v4436_v49, %v4434_v48  ;;  %v4437_v8 = vld [vmem:[%s7295_s9 + $0x280] sm:$0xff]  ;;  %v4478_v48 = vld [vmem:[%s7295_s9 + $0x3a8] sm:$0xff] }
 0x4c1   : > { %5223 = vmatprep.subr.bf16.mxu0 %v5222_v52  ;;  %v4433_v52 = vld [vmem:[%s7295_s9 + $0x260] sm:$0xff] }
 0x4c2   : > { %v5256_v56 = vpack.c.bf16 %v4435_v53, %v4433_v52  ;;  %v4477_v52 = vld [vmem:[%s7295_s9 + $0x3a0] sm:$0xff] }
 0x4c4   : > { %5225 = vmatpush1.bf16.msra.mxu0 %v5224_v61  ;;  %v4444_v61 = vld [vmem:[%s7295_s9 + $0x2b8] sm:$0xff] }
 0x4c5   : > { %5227 = vmatprep.subr.bf16.mxu0 %v5226_v62  ;;  %v5260_v62 = vpack.c.bf16 %v4439_v59, %v4437_v8  ;;  %v5262_v63 = vpack.c.bf16 %v4444_v61, %v4442_v60  ;;  %v4487_v8 = vld [vmem:[%s7295_s9 + $0x3d0] sm:$0xff]  ;;  %v4490_v59 = vld [vmem:[%s7295_s9 + $0x3e8] sm:$0xff]  ;;  %v4492_v60 = vld [vmem:[%s7295_s9 + $0x3f8] sm:$0xff] }
 0x4c6   : > { %v4479_v61 = vld [vmem:[%s7295_s9 + $0x3b0] sm:$0xff]  ;;  %v5306_v2 = vpack.c.bf16 %v4492_v60, %v4490_v59  ;;  %v3072_v60 = vld [vmem:[%s7298_s12 + $0x40] sm:$0xff] }
 0x4c8   : > { %5229 = vmatpush1.bf16.msra.mxu0 %v5228_v10  ;;  %v4451_v10 = vld [vmem:[%s7295_s9 + $0x2d0] sm:$0xff] }
 0x4c9   : > { %5231 = vmatprep.subr.bf16.mxu0 %v5230_v11  ;;  %v4453_v11 = vld [vmem:[%s7295_s9 + $0x2e0] sm:$0xff] }
 0x4ca   : > { %v5272_v16 = vpack.c.bf16 %v4453_v11, %v4451_v10  ;;  %v4493_v11 = vld [vmem:[%s7295_s9 + $0x400] sm:$0xff] }
 0x4cc   : > { %5233 = vmatpush1.bf16.msra.mxu0 %v5232_v17  ;;  %v5274_v17 = vpack.c.bf16 %v4458_v13, %v4456_v12  ;;  %v4495_v12 = vld [vmem:[%s7295_s9 + $0x410] sm:$0xff]  ;;  %v4498_v13 = vld [vmem:[%s7295_s9 + $0x428] sm:$0xff] }
 0x4cd   : > { %2367 = vmatprep.subr.mxu0 %v2154_v18  ;;  %v4455_v18 = vld [vmem:[%s7295_s9 + $0x2f0] sm:$0xff] }
 0x4ce   : > { %v5276_v26 = vpack.c.bf16 %v4457_v19, %v4455_v18  ;;  %v4502_v18 = vld [vmem:[%s7295_s9 + $0x448] sm:$0xff]  ;;  %v4504_v19 = vld [vmem:[%s7295_s9 + $0x458] sm:$0xff] }
 0x4cf   : > { %v5318_v22 = vpack.c.bf16 %v4504_v19, %v4502_v18 }
 0x4d0   : > { %2368 = vmatpush1.msra.mxu0 %v2153_v29  ;;  %v4464_v29 = vld [vmem:[%s7295_s9 + $0x338] sm:$0xff] }
 0x4d1   : > { %4413 = vmatmul.mubr.msk.f32.vlgmr.msra.gmra.mrb[24].mxu0 %vm2261_vm8, %v6482_v7  ;;  %5239 = vmatprep.subr.bf16.mxu0 %v5238_v30  ;;  %v4432_v7 = vld [vmem:[%s7295_s9 + $0x258] sm:$0xff]  ;;  %v5280_v30 = vpack.c.bf16 %v4461_v25, %v4459_v28  ;;  %v4506_v28 = vld [vmem:[%s7295_s9 + $0x468] sm:$0xff] }
 0x4d2   : > { %5241 = vmatpush1.bf16.msra.mxu0 %v5240_v31  ;;  %2583 = vmatprep.mubr.f32.mxu0 %v5611_v1  ;;  %v5250_v44 = vpack.c.bf16 %v4432_v7, %v4430_v42  ;;  %v4474_v42 = vld [vmem:[%s7295_s9 + $0x388] sm:$0xff]  ;;  %v4508_v25 = vld [vmem:[%s7295_s9 + $0x478] sm:$0xff] }
 0x4d3   : > { %5243 = vmatprep.subr.bf16.mxu0 %v5242_v32  ;;  %v4463_v32 = vld [vmem:[%s7295_s9 + $0x330] sm:$0xff] }
 0x4d4   : > { %v5284_v37 = vpack.c.bf16 %v4465_v34, %v4463_v32  ;;  %v4510_v32 = vld [vmem:[%s7295_s9 + $0x488] sm:$0xff]  ;;  %v4512_v34 = vld [vmem:[%s7295_s9 + $0x498] sm:$0xff] }
 0x4d6   : > { %5245 = vmatpush1.bf16.msra.mxu0 %v5244_v38  ;;  %v5286_v38 = vpack.c.bf16 %v4470_v36, %v4468_v33  ;;  %v5326_v36 = vpack.c.bf16 %v4512_v34, %v4510_v32  ;;  %v3311_v34 = vld [vmem:[%s7301_s15 + $0x20] sm:$0xff] }
 0x4d7   : > { %5247 = vmatprep.subr.bf16.mxu0 %v5246_v39  ;;  %v4467_v39 = vld [vmem:[%s7295_s9 + $0x350] sm:$0xff] }
 0x4d8   : > { %v5288_v7 = vpack.c.bf16 %v4469_v40, %v4467_v39  ;;  %v4514_v40 = vld [vmem:[%s7295_s9 + $0x4a8] sm:$0xff] }
 0x4da   : > { %5249 = vmatpush1.bf16.msra.mxu0 %v5248_v43  ;;  %v5290_v43 = vpack.c.bf16 %v4474_v42, %v4472_v41  ;;  %v4513_v41 = vld [vmem:[%s7295_s9 + $0x4a0] sm:$0xff]  ;;  %v2988_v42 = vld [vmem:[%s7297_s11 + $0x90] sm:$0xff] }
 0x4db   : > { %5251 = vmatprep.subr.bf16.mxu0 %v5250_v44  ;;  %v4471_v44 = vld [vmem:[%s7295_s9 + $0x370] sm:$0xff] }
 0x4dc   : > { %v5292_v49 = vpack.c.bf16 %v4473_v45, %v4471_v44 }
 0x4de   : > { %5253 = vmatpush1.bf16.msra.mxu0 %v5252_v50  ;;  %v5294_v50 = vpack.c.bf16 %v4478_v48, %v4476_v47  ;;  %v3064_v47 = vld [vmem:[%s7298_s12] sm:$0xff]  ;;  %v3065_v48 = vld [vmem:[%s7298_s12 + $0x8] sm:$0xff] }
 0x4df   : > { %5255 = vmatprep.subr.bf16.mxu0 %v5254_v51  ;;  %v4475_v51 = vld [vmem:[%s7295_s9 + $0x390] sm:$0xff] }
 0x4e0   : > { %v5296_v53 = vpack.c.bf16 %v4477_v52, %v4475_v51  ;;  %v5361_v52 = vpack.c.bf16 %v3065_v48, %v3064_v47  ;;  %v4521_v48 = vld [vmem:[%s7299_s13 + $0x1] sm:$0x1] }
 0x4e2   : > { %5257 = vmatpush1.bf16.msra.mxu0 %v5256_v56  ;;  %v4488_v56 = vld [vmem:[%s7295_s9 + $0x3d8] sm:$0xff] }
 0x4e3   : > { %5259 = vmatprep.subr.bf16.mxu0 %v5258_v58  ;;  %v4485_v58 = vld [vmem:[%s7295_s9 + $0x3c0] sm:$0xff] }
 0x4e6   : > { %5261 = vmatpush1.bf16.msra.mxu0 %v5260_v62  ;;  %v5302_v62 = vpack.c.bf16 %v4488_v56, %v4486_v55  ;;  %v3069_v55 = vld [vmem:[%s7298_s12 + $0x28] sm:$0xff] }
 0x4e7   : > { %5263 = vmatprep.subr.bf16.mxu0 %v5262_v63  ;;  %v5304_v63 = vpack.c.bf16 %v4487_v8, %v4485_v58  ;;  %v3070_v58 = vld [vmem:[%s7298_s12 + $0x30] sm:$0xff]  ;;  %v3071_v8 = vld [vmem:[%s7298_s12 + $0x38] sm:$0xff] }
 0x4e8   : > { %v5370_v59 = vpack.c.bf16 %v3071_v8, %v3070_v58  ;;  %v4532_v58 = vld [vmem:[%s7301_s15 + $0x88] sm:$0xff] }
 0x4ea   : > { %5265 = vmatpush1.bf16.msra.mxu0 %v5264_v4  ;;  %v4491_v4 = vld [vmem:[%s7295_s9 + $0x3f0] sm:$0xff] }
 0x4eb   : > { %2547 = vmatprep.subr.mxu0 %v4446_v5  ;;  %v4494_v5 = vld [vmem:[%s7295_s9 + $0x408] sm:$0xff]  ;;  %v5308_v9 = vpack.c.bf16 %v4491_v4, %v4489_v3  ;;  %v3076_v4 = vld [vmem:[%s7298_s12 + $0x60] sm:$0xff] }
 0x4ec   : > { %v5310_v10 = vpack.c.bf16 %v4496_v6, %v4494_v5  ;;  %v3077_v5 = vld [vmem:[%s7298_s12 + $0x68] sm:$0xff] }
 0x4ed   : > { %v5379_v6 = vpack.c.bf16 %v3077_v5, %v3076_v4 }
 0x4ee   : > { %2548 = vmatpush1.msra.mxu0 %v4445_v14  ;;  %v5312_v14 = vpack.c.bf16 %v4495_v12, %v4493_v11  ;;  %v3080_v12 = vld [vmem:[%s7298_s12 + $0x80] sm:$0xff] }
 0x4ef   : > { %5271 = vmatprep.subr.bf16.mxu0 %v5270_v15  ;;  %4447 = vmatmul.mubr.msk.f32.vlgmr.msra.gmra.mrb[24].mxu0 %vm2261_vm8, %v6530_v35  ;;  %v4466_v35 = vld [vmem:[%s7295_s9 + $0x348] sm:$0xff] }
 0x4f0   : > { %5273 = vmatpush1.bf16.msra.mxu0 %v5272_v16  ;;  %2765 = vmatprep.mubr.f32.mxu0 %v5611_v1  ;;  %v5282_v31 = vpack.c.bf16 %v4466_v35, %v4464_v29  ;;  %v4497_v16 = vld [vmem:[%s7295_s9 + $0x420] sm:$0xff]  ;;  %v5322_v35 = vpack.c.bf16 %v4508_v25, %v4506_v28  ;;  %v3308_v28 = vld [vmem:[%s7301_s15 + $0x8] sm:$0xff] }
 0x4f1   : > { %5275 = vmatprep.subr.bf16.mxu0 %v5274_v17  ;;  %v4499_v17 = vld [vmem:[%s7295_s9 + $0x430] sm:$0xff]  ;;  %v4551_v25 = vld [vmem:[%s7299_s13 + $0x3] sm:$0x1] }
 0x4f2   : > { %v5316_v20 = vpack.c.bf16 %v4499_v17, %v4497_v16 }
 0x4f4   : > { %5277 = vmatpush1.bf16.msra.mxu0 %v5276_v26  ;;  %v4501_v26 = vld [vmem:[%s7295_s9 + $0x440] sm:$0xff] }
 0x4f5   : > { %5279 = vmatprep.subr.bf16.mxu0 %v5278_v27  ;;  %v4503_v27 = vld [vmem:[%s7295_s9 + $0x450] sm:$0xff] }
 0x4f6   : > { %v5320_v29 = vpack.c.bf16 %v4503_v27, %v4501_v26  ;;  %v3156_v26 = vld [vmem:[%s7299_s13] sm:$0x1] }
 0x4f7   : > { %v3307_v27 = vld [vmem:[%s7301_s15] sm:$0xff] }
 0x4f8   : > { %5281 = vmatpush1.bf16.msra.mxu0 %v5280_v30  ;;  %v4505_v30 = vld [vmem:[%s7295_s9 + $0x460] sm:$0xff] }
 0x4f9   : > { %5283 = vmatprep.subr.bf16.mxu0 %v5282_v31  ;;  %v4507_v31 = vld [vmem:[%s7295_s9 + $0x470] sm:$0xff] }
 0x4fa   : > { %v5324_v33 = vpack.c.bf16 %v4507_v31, %v4505_v30  ;;  %v3309_v30 = vld [vmem:[%s7301_s15 + $0x10] sm:$0xff]  ;;  %v3310_v31 = vld [vmem:[%s7301_s15 + $0x18] sm:$0xff] }
 0x4fb   : > { %v5394_v32 = vpack.c.bf16 %v3310_v31, %v3309_v30 }
 0x4fc   : > { %5285 = vmatpush1.bf16.msra.mxu0 %v5284_v37  ;;  %v4509_v37 = vld [vmem:[%s7295_s9 + $0x480] sm:$0xff] }
 0x4fd   : > { %5287 = vmatprep.subr.bf16.mxu0 %v5286_v38  ;;  %v4511_v38 = vld [vmem:[%s7295_s9 + $0x490] sm:$0xff] }
 0x4fe   : > { %v5328_v39 = vpack.c.bf16 %v4511_v38, %v4509_v37  ;;  %v3313_v37 = vld [vmem:[%s7301_s15 + $0x30] sm:$0xff]  ;;  %v3314_v38 = vld [vmem:[%s7301_s15 + $0x38] sm:$0xff] }
 0x500   : > { %5289 = vmatpush1.bf16.msra.mxu0 %v5288_v7  ;;  %v2989_v7 = vld [vmem:[%s7297_s11 + $0x98] sm:$0xff] }
 0x501   : > { %5291 = vmatprep.subr.bf16.mxu0 %v5290_v43  ;;  %v5358_v43 = vpack.c.bf16 %v2989_v7, %v2988_v42 }
 0x503   : > { %5359 = vmatpush1.bf16.msra.mxu1 %v5358_v43 }
 0x504   : > { %5293 = vmatpush1.bf16.msra.mxu0 %v5292_v49  ;;  %5360 = vmatprep.subr.bf16.mxu1 %v5609_v0 }
 0x505   : > { %5295 = vmatprep.subr.bf16.mxu0 %v5294_v50 }
 0x508   : > { %5297 = vmatpush1.bf16.msra.mxu0 %v5296_v53 }
 0x509   : > { %2729 = vmatprep.subr.mxu0 %v4480_v54  ;;  %v3068_v54 = vld [vmem:[%s7298_s12 + $0x20] sm:$0xff] }
 0x50a   : > { %v5367_v56 = vpack.c.bf16 %v3069_v55, %v3068_v54  ;;  %v4530_v54 = vld [vmem:[%s7301_s15 + $0x78] sm:$0xff] }
 0x50c   : > { %2730 = vmatpush1.msra.mxu0 %v4479_v61  ;;  %v3073_v61 = vld [vmem:[%s7298_s12 + $0x48] sm:$0xff] }
 0x50d   : > { %5303 = vmatprep.subr.bf16.mxu0 %v5302_v62  ;;  %4481 = vmatmul.mubr.msk.f32.vlgmr.msra.gmra.mrb[24].mxu0 %vm2261_vm8, %v6551_v46  ;;  %v4500_v46 = vld [vmem:[%s7295_s9 + $0x438] sm:$0xff]  ;;  %v5373_v62 = vpack.c.bf16 %v3073_v61, %v3072_v60 }
 0x50e   : > { %5305 = vmatpush1.bf16.msra.mxu0 %v5304_v63  ;;  %2947 = vmatprep.mubr.f32.mxu0 %v5611_v1  ;;  %v5314_v15 = vpack.c.bf16 %v4500_v46, %v4498_v13  ;;  %v3074_v63 = vld [vmem:[%s7298_s12 + $0x50] sm:$0xff]  ;;  %v3081_v13 = vld [vmem:[%s7298_s12 + $0x88] sm:$0xff]  ;;  %v4534_v60 = vld [vmem:[%s7301_s15 + $0x98] sm:$0xff] }
 0x50f   : > { %5307 = vmatprep.subr.bf16.mxu0 %v5306_v2  ;;  %v3075_v2 = vld [vmem:[%s7298_s12 + $0x58] sm:$0xff]  ;;  %v5385_v46 = vpack.c.bf16 %v3081_v13, %v3080_v12  ;;  %v4538_v12 = vld [vmem:[%s7300_s14 + $0x2] sm:$0x1] }
 0x510   : > { %v5376_v3 = vpack.c.bf16 %v3075_v2, %v3074_v63 }
 0x512   : > { %5309 = vmatpush1.bf16.msra.mxu0 %v5308_v9  ;;  %v3078_v9 = vld [vmem:[%s7298_s12 + $0x70] sm:$0xff] }
 0x513   : > { %5311 = vmatprep.subr.bf16.mxu0 %v5310_v10  ;;  %v3079_v10 = vld [vmem:[%s7298_s12 + $0x78] sm:$0xff] }
 0x514   : > { %v5382_v11 = vpack.c.bf16 %v3079_v10, %v3078_v9  ;;  %v4536_v9 = vld [vmem:[%s7299_s13 + $0x2] sm:$0x1] }
 0x515   : > { %v4540_v10 = vld [vmem:[%s7301_s15 + $0xa0] sm:$0xff] }
 0x516   : > { %5313 = vmatpush1.bf16.msra.mxu0 %v5312_v14  ;;  %v3082_v14 = vld [vmem:[%s7298_s12 + $0x90] sm:$0xff] }
 0x517   : > { %5315 = vmatprep.subr.bf16.mxu0 %v5314_v15  ;;  %v3083_v15 = vld [vmem:[%s7298_s12 + $0x98] sm:$0xff] }
 0x518   : > { %v5388_v16 = vpack.c.bf16 %v3083_v15, %v3082_v14  ;;  %v4543_v14 = vld [vmem:[%s7301_s15 + $0xb8] sm:$0xff] }
 0x51a   : > { %5317 = vmatpush1.bf16.msra.mxu0 %v5316_v20 }
 0x51b   : > { %5319 = vmatprep.subr.bf16.mxu0 %v5318_v22 }
 0x51e   : > { %5321 = vmatpush1.bf16.msra.mxu0 %v5320_v29  ;;  %v3231_v29 = vld [vmem:[%s7300_s14] sm:$0x1] }
 0x51f   : > { %5323 = vmatprep.subr.bf16.mxu0 %v5322_v35  ;;  %v5391_v35 = vpack.c.bf16 %v3308_v28, %v3307_v27  ;;  %v4549_v27 = vld [vmem:[%s7301_s15 + $0xe8] sm:$0xff] }
 0x522   : > { %5325 = vmatpush1.bf16.msra.mxu0 %v5324_v33  ;;  %v3312_v33 = vld [vmem:[%s7301_s15 + $0x28] sm:$0xff] }
 0x523   : > { %5327 = vmatprep.subr.bf16.mxu0 %v5326_v36  ;;  %v5397_v36 = vpack.c.bf16 %v3312_v33, %v3311_v34  ;;  %v4105_v34 = vld [vmem:[%s7303_s17 + $0x8] sm:$0xff]  ;;  %v4106_v33 = vld [vmem:[%s7303_s17 + $0x10] sm:$0xff] }
 0x526   : > { %5329 = vmatpush1.bf16.msra.mxu0 %v5328_v39  ;;  %v5400_v39 = vpack.c.bf16 %v3314_v38, %v3313_v37  ;;  %v4107_v37 = vld [vmem:[%s7303_s17 + $0x18] sm:$0xff] }
 0x527   : > { %2911 = vmatprep.subr.mxu0 %v4514_v40  ;;  %v3315_v40 = vld [vmem:[%s7301_s15 + $0x40] sm:$0xff]  ;;  %v5454_v38 = vpack.c.bf16 %v4107_v37, %v4106_v33 }
 0x52a   : > { %2912 = vmatpush1.msra.mxu0 %v4513_v41  ;;  %v3316_v41 = vld [vmem:[%s7301_s15 + $0x48] sm:$0xff] }
 0x52b   : > { %4515 = vmatmul.mubr.msk.f32.vlgmr.msra.gmra.mrb[24].mxu0 %vm2261_vm8, %v6572_v57  ;;  %4937 = vmatprep.subr.mxu0 %v5611_v1  ;;  %v2956_v57 = vld [vmem:[%s7296_s10] sm:$0x3]  ;;  %v5403_v42 = vpack.c.bf16 %v3316_v41, %v3315_v40  ;;  %v4555_v41 = vld [vmem:[%s7301_s15 + $0xf0] sm:$0xff] }
 0x52c   : > { %4939 = vmatprep.mubr.msk.f32.mxu0 %vm5610_vm0, %v5611_v1  ;;  %v2965_v44 = vrot.slane %v2956_v57, %v1633_v24  ;;  %v2961_v45 = vrot.slane %v2956_v57, %v1629_v21  ;;  %v3066_v24 = vld [vmem:[%s7298_s12 + $0x10] sm:$0xff] }
 0x52d   : > { %v5364_v21 = vpack.c.bf16 %v3067_v23, %v3066_v24  ;;  %v4528_v24 = vld [vmem:[%s7301_s15 + $0x68] sm:$0xff] }
 0x5fe   : > { %v2949_v49 = vpop.f32.mrb[24].mxu0 }
 0x5ff   : > { %v2951_v50 = vpop.f32.mrb[25].mxu0  ;;  %v2968_v53 = vadd.f32 %v2961_v45, %v2949_v49  ;;  %v4525_v49 = vld [vmem:[%s7301_s15 + $0x50] sm:$0xff] }
 0x600   : > { %v2969_v51 = vadd.f32 %v2965_v44, %v2951_v50  ;;  %v4526_v50 = vld [vmem:[%s7301_s15 + $0x58] sm:$0xff] }
 0x602   : > { %4516 = vmatprep.mubr.msk.f32.mxu1 %vm2990_vm9, %v2969_v51 }
 0x603   : > { %3059 = vmatmul.mubr.f32.vlgmr.msra.gmra.mrb[38].mxu1 %v2968_v53 }
 0x604   : > { %5362 = vmatpush1.bf16.msra.mxu1 %v5361_v52  ;;  %4517 = vmatprep.mubr.msk.f32.mxu1 %vm2990_vm9, %v2969_v51  ;;  %v4523_v51 = vld [vmem:[%s7300_s14 + $0x1] sm:$0x1]  ;;  %v5406_v52 = vpack.c.bf16 %v4526_v50, %v4525_v49  ;;  %v4559_v50 = vld [vmem:[%s7301_s15 + $0x110] sm:$0xff] }
 0x605   : > { %5363 = vmatprep.subr.bf16.mxu1 %v5609_v0 }
 0x608   : > { %5365 = vmatpush1.bf16.msra.mxu1 %v5364_v21  ;;  %v4529_v21 = vld [vmem:[%s7301_s15 + $0x70] sm:$0xff] }
 0x609   : > { %5366 = vmatprep.subr.bf16.mxu1 %v5609_v0  ;;  %v5412_v55 = vpack.c.bf16 %v4530_v54, %v4529_v21  ;;  %v4563_v21 = vld [vmem:[%s7301_s15 + $0x130] sm:$0xff]  ;;  %v4564_v54 = vld [vmem:[%s7301_s15 + $0x138] sm:$0xff] }
 0x60c   : > { %5368 = vmatpush1.bf16.msra.mxu1 %v5367_v56  ;;  %v4531_v56 = vld [vmem:[%s7301_s15 + $0x80] sm:$0xff] }
 0x60d   : > { %5369 = vmatprep.subr.bf16.mxu1 %v5609_v0  ;;  %v5415_v8 = vpack.c.bf16 %v4532_v58, %v4531_v56  ;;  %v4108_v58 = vld [vmem:[%s7303_s17 + $0x20] sm:$0xff] }
 0x610   : > { %5371 = vmatpush1.bf16.msra.mxu1 %v5370_v59  ;;  %v4533_v59 = vld [vmem:[%s7301_s15 + $0x90] sm:$0xff] }
 0x611   : > { %5372 = vmatprep.subr.bf16.mxu1 %v5609_v0  ;;  %v5418_v61 = vpack.c.bf16 %v4534_v60, %v4533_v59  ;;  %v3155_v60 = vld [vmem:[%s7302_s16] sm:$0x1] }
 0x614   : > { %5374 = vmatpush1.bf16.msra.mxu1 %v5373_v62  ;;  %v4553_v62 = vld [vmem:[%s7300_s14 + $0x3] sm:$0x1] }
 0x615   : > { %5375 = vmatprep.subr.bf16.mxu1 %v5609_v0 }
 0x618   : > { %5377 = vmatpush1.bf16.msra.mxu1 %v5376_v3 }
 0x619   : > { %5378 = vmatprep.subr.bf16.mxu1 %v5609_v0 }
 0x61c   : > { %5380 = vmatpush1.bf16.msra.mxu1 %v5379_v6 }
 0x61d   : > { %5381 = vmatprep.subr.bf16.mxu1 %v5609_v0 }
 0x620   : > { %5383 = vmatpush1.bf16.msra.mxu1 %v5382_v11  ;;  %v4541_v11 = vld [vmem:[%s7301_s15 + $0xa8] sm:$0xff] }
 0x621   : > { %5384 = vmatprep.subr.bf16.mxu1 %v5609_v0  ;;  %v5421_v13 = vpack.c.bf16 %v4541_v11, %v4540_v10 }
 0x624   : > { %5386 = vmatpush1.bf16.msra.mxu1 %v5385_v46  ;;  %v4542_v46 = vld [vmem:[%s7301_s15 + $0xb0] sm:$0xff] }
 0x625   : > { %5387 = vmatprep.subr.bf16.mxu1 %v5609_v0  ;;  %v5424_v15 = vpack.c.bf16 %v4543_v14, %v4542_v46 }
 0x628   : > { %5389 = vmatpush1.bf16.msra.mxu1 %v5388_v16  ;;  %v4544_v16 = vld [vmem:[%s7301_s15 + $0xc0] sm:$0xff] }
 0x629   : > { %4838 = vmatprep.subr.mxu1 %v5611_v1 }
 0x62b   : > { %3149 = vmatmul.mubr.f32.vlgmr.msra.gmra.mrb[40].mxu1 %v2968_v53  ;;  %v4527_v53 = vld [vmem:[%s7301_s15 + $0x60] sm:$0xff] }
 0x62c   : > { %4840 = vmatprep.mubr.msk.f32.mxu1 %vm5610_vm0, %v5611_v1  ;;  %v5409_v23 = vpack.c.bf16 %v4528_v24, %v4527_v53  ;;  %v4561_v53 = vld [vmem:[%s7301_s15 + $0x120] sm:$0xff]  ;;  %v4562_v24 = vld [vmem:[%s7301_s15 + $0x128] sm:$0xff] }
 0x6d6   : > { %v3060_v17 = vpop.f32.mrb[38].mxu1 }
 0x6d7   : > { %v3062_v18 = vpop.f32.mrb[39].mxu1 }
 0x6fe   : > { %v3150_v19 = vpop.f32.mrb[40].mxu1 }
 0x6ff   : > { %v6991_v20 = vmax.f32 %v3060_v17, %v3150_v19  ;;  %v3152_v22 = vpop.f32.mrb[41].mxu1  ;;  %v4545_v17 = vld [vmem:[%s7301_s15 + $0xc8] sm:$0xff]  ;;  %v4546_v19 = vld [vmem:[%s7301_s15 + $0xd0] sm:$0xff] }
 0x700   : > { %v5427_v18 = vpack.c.bf16 %v4545_v17, %v4544_v16 }
 0x701   : > { %4839 = vmatpush3.msra.mxu1 %v6991_v20  ;;  %4938 = vmatpush3.msra.mxu0 %v6991_v20 }
 0x702   : > { %4841 = vmatmul.mubr.msk.f32.vlgmr.msra.gmra.mrb[42].mxu1 %vm3157_vm10, %v3156_v26  ;;  %4843 = vmatprep.subr.mxu1 %v5611_v1  ;;  %v4548_v26 = vld [vmem:[%s7301_s15 + $0xe0] sm:$0xff] }
 0x703   : > { %4942 = vmatprep.subr.mxu0 %v5611_v1  ;;  %4844 = vmatpush3.msra.mxu1 %v6991_v20  ;;  %v5433_v28 = vpack.c.bf16 %v4549_v27, %v4548_v26 }
 0x704   : > { %4940 = vmatmul.mubr.msk.f32.vlgmr.msra.gmra.mrb[26].mxu0 %vm3157_vm10, %v4551_v25  ;;  %4845 = vmatprep.mubr.msk.f32.mxu1 %vm5610_vm0, %v5611_v1 }
 0x705   : > { %4943 = vmatpush3.msra.mxu0 %v6991_v20  ;;  %5390 = vmatprep.subr.bf16.mxu1 %v5609_v0 }
 0x706   : > { %4846 = vmatmul.mubr.msk.f32.vlgmr.msra.gmra.mrb[44].mxu1 %vm3157_vm10, %v3231_v29  ;;  %4944 = vmatprep.mubr.msk.f32.mxu0 %vm5610_vm0, %v5611_v1 }
 0x707   : > { %5392 = vmatpush3.bf16.msra.mxu1 %v5391_v35  ;;  %4868 = vmatprep.mubr.msk.f32.mxu1 %vm5610_vm0, %v5611_v1 }
 0x708   : > { %5393 = vmatprep.subr.bf16.mxu1 %v5609_v0  ;;  %5450 = vmatprep.subr.bf16.mxu0 %v5609_v0 }
 0x709   : > { %4945 = vmatmul.mubr.msk.f32.vlgmr.msra.gmra.mrb[28].mxu0 %vm3157_vm10, %v4553_v62 }
 0x70a   : > { %4984 = vmatprep.mubr.msk.f32.mxu0 %vm5610_vm0, %v5611_v1 }
 0x70b   : > { %5395 = vmatpush3.bf16.msra.mxu1 %v5394_v32  ;;  %v4104_v32 = vld [vmem:[%s7303_s17] sm:$0xff] }
 0x70c   : > { %5396 = vmatprep.subr.bf16.mxu1 %v5609_v0 }
 0x70f   : > { %5398 = vmatpush3.bf16.msra.mxu1 %v5397_v36  ;;  %v5451_v36 = vpack.c.bf16 %v4105_v34, %v4104_v32 }
 0x710   : > { %5399 = vmatprep.subr.bf16.mxu1 %v5609_v0 }
 0x711   : > { %5452 = vmatpush3.bf16.msra.mxu0 %v5451_v36 }
 0x712   : > { %5453 = vmatprep.subr.bf16.mxu0 %v5609_v0 }
 0x713   : > { %5401 = vmatpush3.bf16.msra.mxu1 %v5400_v39 }
 0x714   : > { %5402 = vmatprep.subr.bf16.mxu1 %v5609_v0 }
 0x715   : > { %5455 = vmatpush3.bf16.msra.mxu0 %v5454_v38 }
 0x716   : > { %5456 = vmatprep.subr.bf16.mxu0 %v5609_v0 }
 0x717   : > { %5404 = vmatpush3.bf16.msra.mxu1 %v5403_v42  ;;  %v4556_v42 = vld [vmem:[%s7301_s15 + $0xf8] sm:$0xff] }
 0x718   : > { %4871 = vmatprep.subr.mxu1 %v5611_v1 }
 0x7d5   : > { %v3227_v7 = vpop.f32.mrb[42].mxu1 }
 0x7d6   : > { %v4842_v43 = vpop.f32.mrb[43].mxu1 }
 0x7d7   : > { %v3937_v25 = vpop.f32.mrb[26].mxu0 }
 0x7d8   : > { %v4941_v29 = vpop.f32.mrb[27].mxu0 }
 0x7d9   : > { %v3301_v57 = vpop.f32.mrb[44].mxu1 }
 0x7da   : > { %v3305_v44 = vmax.f32 %v3227_v7, %v3301_v57  ;;  %v4847_v45 = vpop.f32.mrb[45].mxu1 }
 0x7dc   : > { %v3306_v47 = vmax.f32 %v3305_v44, 0.0  ;;  %v4012_v35 = vpop.f32.mrb[28].mxu0  ;;  %v5436_v44 = vpack.c.bf16 %v4556_v42, %v4555_v41 }
 0x7dd   : > { %v4016_v30 = vmax.f32 %v3937_v25, %v4012_v35  ;;  %v4946_v31 = vpop.f32.mrb[29].mxu0 }
 0x7de   : > { %4869 = vmatmul.mubr.msk.f32.vlgmr.msra.gmra.mrb[46].mxu1 %vm3317_vm11, %v3306_v47  ;;  %v4557_v47 = vld [vmem:[%s7301_s15 + $0x100] sm:$0xff] }
 0x7df   : > { %4872 = vmatpush3.msra.mxu1 %v6991_v20  ;;  %4873 = vmatprep.mubr.msk.f32.mxu1 %vm5610_vm0, %v5611_v1  ;;  %v4017_v56 = vmax.f32 %v4016_v30, 0.0 }
 0x7e0   : > { %4876 = vmatprep.subr.mxu1 %v5611_v1 }
 0x7e2   : > { %4874 = vmatmul.mubr.msk.f32.vlgmr.msra.gmra.mrb[48].mxu1 %vm3157_vm10, %v4521_v48  ;;  %v4558_v48 = vld [vmem:[%s7301_s15 + $0x108] sm:$0xff] }
 0x7e3   : > { %4877 = vmatpush3.msra.mxu1 %v6991_v20  ;;  %4878 = vmatprep.mubr.msk.f32.mxu1 %vm5610_vm0, %v5611_v1  ;;  %v5439_v49 = vpack.c.bf16 %v4558_v48, %v4557_v47 }
 0x7e4   : > { %5405 = vmatprep.subr.bf16.mxu1 %v5609_v0 }
 0x7e6   : > { %4879 = vmatmul.mubr.msk.f32.vlgmr.msra.gmra.mrb[50].mxu1 %vm3157_vm10, %v4523_v51  ;;  %v4560_v51 = vld [vmem:[%s7301_s15 + $0x118] sm:$0xff] }
 0x7e7   : > { %5407 = vmatpush3.bf16.msra.mxu1 %v5406_v52  ;;  %4901 = vmatprep.mubr.msk.f32.mxu1 %vm5610_vm0, %v5611_v1  ;;  %v5442_v52 = vpack.c.bf16 %v4560_v51, %v4559_v50 }
 0x7e8   : > { %5408 = vmatprep.subr.bf16.mxu1 %v5609_v0 }
 0x7eb   : > { %5410 = vmatpush3.bf16.msra.mxu1 %v5409_v23  ;;  %v5445_v23 = vpack.c.bf16 %v4562_v24, %v4561_v53 }
 0x7ec   : > { %5411 = vmatprep.subr.bf16.mxu1 %v5609_v0 }
 0x7ef   : > { %5413 = vmatpush3.bf16.msra.mxu1 %v5412_v55  ;;  %v5448_v55 = vpack.c.bf16 %v4564_v54, %v4563_v21 }
 0x7f0   : > { %5414 = vmatprep.subr.bf16.mxu1 %v5609_v0 }
 0x7f3   : > { %5416 = vmatpush3.bf16.msra.mxu1 %v5415_v8  ;;  %v4109_v8 = vld [vmem:[%s7303_s17 + $0x28] sm:$0xff] }
 0x7f4   : > { %5417 = vmatprep.subr.bf16.mxu1 %v5609_v0  ;;  %v5457_v59 = vpack.c.bf16 %v4109_v8, %v4108_v58 }
 0x7f6   : > { %5458 = vmatpush3.bf16.msra.mxu0 %v5457_v59 }
 0x7f7   : > { %5419 = vmatpush3.bf16.msra.mxu1 %v5418_v61  ;;  %4982 = vmatprep.subr.mxu0 %v5611_v1 }
 0x7f8   : > { %4904 = vmatprep.subr.mxu1 %v5611_v1 }
 0x8b5   : > { %v3463_v63 = vpop.f32.mrb[48].mxu1 }
 0x8b6   : > { %v4875_v2 = vpop.f32.mrb[49].mxu1 }
 0x8b9   : > { %v3538_v3 = vpop.f32.mrb[50].mxu1 }
 0x8ba   : > { %v3542_v4 = vmax.f32 %v3463_v63, %v3538_v3  ;;  %v4880_v5 = vpop.f32.mrb[51].mxu1 }
 0x8bc   : > { %v3543_v6 = vmax.f32 %v3542_v4, 0.0 }
 0x8be   : > { %4902 = vmatmul.mubr.msk.f32.vlgmr.msra.gmra.mrb[46].mxu1 %vm3317_vm11, %v3543_v6 }
 0x8bf   : > { %4905 = vmatpush3.msra.mxu1 %v6991_v20  ;;  %4906 = vmatprep.mubr.msk.f32.mxu1 %vm5610_vm0, %v5611_v1 }
 0x8c0   : > { %4909 = vmatprep.subr.mxu1 %v5611_v1 }
 0x8c2   : > { %4907 = vmatmul.mubr.msk.f32.vlgmr.msra.gmra.mrb[52].mxu1 %vm3157_vm10, %v4536_v9 }
 0x8c3   : > { %4910 = vmatpush3.msra.mxu1 %v6991_v20  ;;  %4911 = vmatprep.mubr.msk.f32.mxu1 %vm5610_vm0, %v5611_v1  ;;  %v4547_v20 = vld [vmem:[%s7301_s15 + $0xd8] sm:$0xff] }
 0x8c4   : > { %5420 = vmatprep.subr.bf16.mxu1 %v5609_v0  ;;  %v5430_v22 = vpack.c.bf16 %v4547_v20, %v4546_v19 }
 0x8c6   : > { %4912 = vmatmul.mubr.msk.f32.vlgmr.msra.gmra.mrb[54].mxu1 %vm3157_vm10, %v4538_v12 }
 0x8c7   : > { %5422 = vmatpush3.bf16.msra.mxu1 %v5421_v13  ;;  %4934 = vmatprep.mubr.msk.f32.mxu1 %vm5610_vm0, %v5611_v1 }
 0x8c8   : > { %5423 = vmatprep.subr.bf16.mxu1 %v5609_v0 }
 0x8cb   : > { %5425 = vmatpush3.bf16.msra.mxu1 %v5424_v15 }
 0x8cc   : > { %5426 = vmatprep.subr.bf16.mxu1 %v5609_v0 }
 0x8cf   : > { %5428 = vmatpush3.bf16.msra.mxu1 %v5427_v18 }
 0x8d0   : > { %5429 = vmatprep.subr.bf16.mxu1 %v5609_v0 }
 0x8d3   : > { %5431 = vmatpush3.bf16.msra.mxu1 %v5430_v22 }
 0x8d4   : > { %5432 = vmatprep.subr.bf16.mxu1 %v5609_v0 }
 0x8d7   : > { %5434 = vmatpush3.bf16.msra.mxu1 %v5433_v28 }
 0x8d8   : > { %5435 = vmatprep.subr.bf16.mxu1 %v5609_v0 }
 0x995   : > { %v3700_v39 = vpop.f32.mrb[52].mxu1 }
 0x996   : > { %v4908_v40 = vpop.f32.mrb[53].mxu1 }
 0x999   : > { %v3775_v7 = vpop.f32.mrb[54].mxu1 }
 0x99a   : > { %v3779_v43 = vmax.f32 %v3700_v39, %v3775_v7  ;;  %v4913_v57 = vpop.f32.mrb[55].mxu1 }
 0x99c   : > { %v3780_v45 = vmax.f32 %v3779_v43, 0.0 }
 0x99e   : > { %4935 = vmatmul.mubr.msk.f32.vlgmr.msra.gmra.mrb[46].mxu1 %vm3317_vm11, %v3780_v45 }
 0x99f   : > { %5437 = vmatpush3.bf16.msra.mxu1 %v5436_v44  ;;  %4967 = vmatprep.mubr.msk.f32.mxu1 %vm5610_vm0, %v5611_v1  ;;  %v4111_v1 = vld [vmem:[%s7304_s18] sm:$0x1] }
 0x9a0   : > { %5438 = vmatprep.subr.bf16.mxu1 %v5609_v0 }
 0x9a3   : > { %5440 = vmatpush3.bf16.msra.mxu1 %v5439_v49 }
 0x9a4   : > { %5441 = vmatprep.subr.bf16.mxu1 %v5609_v0 }
 0x9a7   : > { %5443 = vmatpush3.bf16.msra.mxu1 %v5442_v52 }
 0x9a8   : > { %5444 = vmatprep.subr.bf16.mxu1 %v5609_v0 }
 0x9ab   : > { %5446 = vmatpush3.bf16.msra.mxu1 %v5445_v23 }
 0x9ac   : > { %5447 = vmatprep.subr.bf16.mxu1 %v5609_v0  ;;  %v4110_v0 = vld [vmem:[%s7303_s17 + $0x30] sm:$0x3] }
 0x9ad   : > { %4983 = vmatpush3.msk.msra.mxu0 %vm4116_vm12, %v4110_v0 }
 0x9af   : > { %5449 = vmatpush3.bf16.msra.mxu1 %v5448_v55 }
 0x9b2   : > { %4968 = vmatmul.mubr.msk.f32.vlgmr.msra.gmra.mrb[46].mxu1 %vm3317_vm11, %v4017_v56 }
 0xa85   : > { %v4098_v61 = vpop.f32.mrb[46].mxu1 }
 0xa86   : > { %v5459_v62 = vadd.f32 %v4098_v61, %v3155_v60  ;;  %v4969_v63 = vpop.f32.mrb[47].mxu1 }
 0xa88   : > { %v4103_v2 = vmax.f32 %v5459_v62, 0.0 }
 0xa8a   : > { %4985 = vmatmul.mubr.msk.f32.vlgmr.msra.gmra.mrb[30].mxu0 %vm4112_vm13, %v4103_v2 }
 0xb5d   : > { %v4186_v3 = vpop.f32.mrb[30].mxu0 }
 0xb5e   : > { %v4187_v4 = vadd.f32 %v4186_v3, %v4111_v1  ;;  %v4986_v5 = vpop.f32.mrb[31].mxu0 }
 0xb60   : > { %v4191_v6 = vsel %vm4190_vm14, %v4187_v4, -inf }
 0xb61   : > { %4192 = vmax.xlane.f32.xlu0 %v4191_v6 }
 0xbee   : > { %v4193_v9 = vpop.xlane.xlu0 %4192 }
 0xbef   : > { %v4194_v10 = vsub.f32 %v4187_v4, %v4193_v9 }
 0xbf1   : > { %v4195_v11 = vmul.f32 1.442695, %v4194_v10 }
 0xbf3   : > { %5541 = vpow2.f32 %v4195_v11 }
 0xbfd   : > { %v5542_v12 = vpop.eup %5541 }
 0xbfe   : > { %v4197_v13 = vsel %vm4190_vm14, %v5542_v12, 0.0 }
 0xbff   : > { %4198 = vadd.xlane.f32.xlu0 %v4197_v13 }
 0xc8c   : > { %v4199_v46 = vpop.xlane.xlu0 %4198 }
 0xc8d   : > { %5543 = vlog2.f32 %v4199_v46 }
 0xc97   : > { %v5544_v14 = vpop.eup %5543 }
 0xc98   : > { %v4201_v15 = vmul.f32 0.6931472, %v5544_v14 }
 0xc9a   : > { %v4202_v16 = vsub.f32 %v4194_v10, %v4201_v15 }
 0xc9c   : > { %4203 = vst.msk [vmem:[%s594_s22] sm:$0x1] %vm4190_vm14, %v4202_v16 }
 0xc9d   : > { %5558 = shalt.err (!%p5555_p3)
}
 0xc9e   : > { %s5559_s26 = scalar_lea.hbm %s7243_s24, 16  ;;  %s5563_s21 = scalar_lea.hbm %s7336_s25, 32 }
 0xc9f   : > { %p5560_p4 = scmp.ne.s32.totalorder %s7243_s24, %s5559_s26  ;;  %p5564_p9 = scmp.lt.u32.totalorder %s7243_s24, %s7336_s25 }
 0xca0   : > { %p5565_p10 = scmp.lt.u32.totalorder %s5563_s21, %s5559_s26  ;;  %p5567_p12 = scmp.lt.u32.totalorder %s5559_s26, %s7243_s24 }
 0xca1   : > { %p5561_p7 = pnand %p5560_p4, %p5752_p5 }
 0xca2   : > { %p5566_p11 = por %p5565_p10, %p5564_p9 }
 0xca3   : > { %p5562_p8 = pneg %p5561_p7 }
 0xca4   : > { %p5568_p13 = por %p5567_p12, %p5566_p11 }
 0xca6   : > { %p5569_p0 = pnand %p5568_p13, %p5562_p8 }
 0xca8   : > { %5572 = shalt.err (!%p5569_p0)
}
 0xca9   : > { %5498 = dma.vmem_to_hbm [thread:$0]  (%p5752_p5), %s7245_s19, 16, %s7243_s24, %s4205_s20  }
 0xcaa PF: > { %s7337_s2 = sld [smem:[#allocation7_spill]]  ;;  %s7338_s27 = sld [smem:[#allocation5_spill]] }
 0xcb0   : > { %p5504_p1 = scmp.ge.s32.totalorder %s7337_s2, 2  ;;  %s4229_s28 = sand.u32 1, %s7338_s27  }
 0xcb1   : > { %s4230_s22 = scalar_lea.sflag [#allocation3], %s4229_s28 }
 0xcb2   : > { %p5501_p2 = pnand %p5504_p1, %p5756_p6 }
 0xcb4   : > { %5590 = dma.done.wait (!%p5501_p2), %s4230_s22, 16  }
 0xcb5   : > { %5592 = vsyncadd (!%p5501_p2), %s4230_s22, 4294967280  ;;  %s7340_s21 = sld [smem:[#allocation8_spill]]  ;;  %s7341_s26 = sld [smem:[#allocation6_spill]] }
 0xcb6   : > { %s7342_s20 = sld [smem:[#allocation9_spill]]  ;;  %s7343_s0 = smov %s5599_s30 }
 0xcbb   : > { %p29_p3 = scmp.ge.s32.totalorder %s7340_s21, 4   ;;  %s7344_s30 = smov %s7341_s26 }
 0xcbd   :  { %31 = sbr.rel (!%p29_p3) target bundleno = 9 (0x9), region = 156 }
 0xcc4   :  { %4234 = vsyncpa [#allocation3], 1 }
 0xcc5   :  { %4236 = vsyncpa [#allocation3 + $0x1], 1 }

</bundles_post_ra>
